<compile_context>
chip_gen: v7x
topology: tpu7x:2x2x1
jax: 0.10.0
libtpu: 0.0.40
codegen_flags: <defaults>
</compile_context>

<pallas_src>
import functools

import jax
import jax.numpy as jnp
from jax.experimental import pallas as pl
from jax.experimental.pallas import tpu as pltpu

LN_EPS = 1e-5  # torch nn.LayerNorm default


def _layer_norm(y, gamma, beta):
    mu = jnp.mean(y, axis=-1, keepdims=True)
    var = jnp.mean((y - mu) ** 2, axis=-1, keepdims=True)
    return (y - mu) * jax.lax.rsqrt(var + LN_EPS) * gamma + beta


def transformer_kernel(num_heads,
                       x_ref,
                       wqkv_ref, bqkv_ref,
                       ln1g_ref, ln1b_ref,
                       w1_ref, b1_ref, w2_ref, b2_ref,
                       ln2g_ref, ln2b_ref,
                       out_ref,
                       qh_sc, kh_sc, vh_sc, ctx_sc):
    bb, s, f_in = x_ref.shape          # batch-block, seq, in_features
    f_out = w1_ref.shape[0]
    dh = f_out // num_heads
    rows = bb * s
    scale = 1.0 / (float(dh) ** 0.5)

    # ---- fused Q|K|V projection: one wide bf16 MXU matmul, f32 accumulate ----
    x2 = x_ref[...].reshape(rows, f_in).astype(jnp.bfloat16)
    qkv = jnp.dot(x2, wqkv_ref[...],
                  preferred_element_type=jnp.float32) + bqkv_ref[...]   # (rows, 3F) f32

    q_res = qkv[:, 0:f_out]                        # f32 query, reused for the residual
    q_att = (q_res * scale).astype(jnp.bfloat16)   # scale folded into q once
    k_att = qkv[:, f_out:2 * f_out].astype(jnp.bfloat16)
    v_att = qkv[:, 2 * f_out:3 * f_out].astype(jnp.bfloat16)

    # ---- scatter heads into (bb*H, S, dh) VMEM slabs (static slices only) ----
    for b in range(bb):
        r0 = b * s
        for h in range(num_heads):
            c0 = h * dh
            g = b * num_heads + h
            qh_sc[g] = q_att[r0:r0 + s, c0:c0 + dh]
            kh_sc[g] = k_att[r0:r0 + s, c0:c0 + dh]
            vh_sc[g] = v_att[r0:r0 + s, c0:c0 + dh]

    # ---- head-batched attention: two batched MXU einsums over all heads ----
    qh = qh_sc[...]                                 # (G, S, dh) bf16
    kh = kh_sc[...]
    vh = vh_sc[...]
    sc = jnp.einsum('gqd,gkd->gqk', qh, kh,
                    preferred_element_type=jnp.float32)              # (G, S, S) f32
    sc = sc - jnp.max(sc, axis=-1, keepdims=True)
    p = jnp.exp(sc)
    p = p * pl.reciprocal(jnp.sum(p, axis=-1, keepdims=True), approx=True)
    ctx = jnp.einsum('gqk,gkd->gqd', p.astype(jnp.bfloat16), vh,
                     preferred_element_type=jnp.float32)             # (G, S, dh) f32

    # "concat heads" by writing each head's context into a lane slab in VMEM
    for b in range(bb):
        r0 = b * s
        for h in range(num_heads):
            c0 = h * dh
            g = b * num_heads + h
            ctx_sc[r0:r0 + s, c0:c0 + dh] = ctx[g]
    context = ctx_sc[...]                                            # (rows, F) f32

    # ---- residual + LayerNorm 1 (dropout == identity in eval mode) ----
    add_1 = context + q_res
    norm_1 = _layer_norm(add_1, ln1g_ref[...], ln1b_ref[...])

    # ---- feed-forward: Linear -> ReLU -> Linear (bf16 MXU, f32 accumulate) ----
    h1 = jnp.dot(norm_1.astype(jnp.bfloat16), w1_ref[...],
                 preferred_element_type=jnp.float32) + b1_ref[...]
    h1 = jnp.maximum(h1, 0.0)
    ff = jnp.dot(h1.astype(jnp.bfloat16), w2_ref[...],
                 preferred_element_type=jnp.float32) + b2_ref[...]

    # ---- residual + LayerNorm 2 ----
    add_2 = norm_1 + ff
    norm_2 = _layer_norm(add_2, ln2g_ref[...], ln2b_ref[...])

    out_ref[...] = norm_2.reshape(bb, s, f_out).astype(out_ref.dtype)


def _pick_batch_block(batch, requested):
    bb = max(1, min(requested, batch))
    while batch % bb:
        bb -= 1
    return bb


def transformer_forward(x, params, num_heads, *, batch_block=8):
    """x: (B, S, F_in) float32. Returns (B, S, F_out) float32."""
    B, S, F_in = x.shape
    F_out = params["wq"].shape[1]
    assert F_out % num_heads == 0, "out_features must be divisible by num_heads"
    dh = F_out // num_heads
    bb = _pick_batch_block(B, batch_block)

    # Host-side weight prep: fuse Q|K|V and pre-cast matmul weights to bf16
    # (halves weight DMA bytes; biases / LN params stay f32 for accumulation).
    w_qkv = jnp.concatenate([params["wq"], params["wk"], params["wv"]],
                            axis=1).astype(jnp.bfloat16)             # (F_in, 3F)
    b_qkv = jnp.concatenate([params["bq"], params["bk"], params["bv"]],
                            axis=1)                                  # (1, 3F) f32
    w1 = params["w1"].astype(jnp.bfloat16)
    w2 = params["w2"].astype(jnp.bfloat16)

    weights = [w_qkv, b_qkv,
               params["ln1_g"], params["ln1_b"],
               w1, params["b1"], w2, params["b2"],
               params["ln2_g"], params["ln2_b"]]

    full2d = lambda a: pl.BlockSpec(a.shape, lambda i: (0, 0))

    kernel = functools.partial(transformer_kernel, num_heads)

    return pl.pallas_call(
        kernel,
        out_shape=jax.ShapeDtypeStruct((B, S, F_out), jnp.float32),
        grid_spec=pltpu.PrefetchScalarGridSpec(
            num_scalar_prefetch=0,
            grid=(B // bb,),
            in_specs=[pl.BlockSpec((bb, S, F_in), lambda i: (i, 0, 0))]
                     + [full2d(w) for w in weights],
            out_specs=pl.BlockSpec((bb, S, F_out), lambda i: (i, 0, 0)),
            scratch_shapes=[
                pltpu.VMEM((bb * num_heads, S, dh), jnp.bfloat16),   # q heads
                pltpu.VMEM((bb * num_heads, S, dh), jnp.bfloat16),   # k heads
                pltpu.VMEM((bb * num_heads, S, dh), jnp.bfloat16),   # v heads
                pltpu.VMEM((bb * S, F_out), jnp.float32),            # context slab
            ]),
        compiler_params=pltpu.CompilerParams(
            dimension_semantics=("parallel",),
            vmem_limit_bytes=32 * 1024 * 1024),
    )(x, *weights)


def reference_forward(x, params, num_heads):
    """Pure-JAX f32 reference of the same forward pass (for validation)."""
    B, S, _ = x.shape
    F_out = params["wq"].shape[1]
    dh = F_out // num_heads
    q = jnp.einsum('bsf,fo->bso', x, params["wq"]) + params["bq"]
    k = jnp.einsum('bsf,fo->bso', x, params["wk"]) + params["bk"]
    v = jnp.einsum('bsf,fo->bso', x, params["wv"]) + params["bv"]
    qh = q.reshape(B, S, num_heads, dh).transpose(0, 2, 1, 3)
    kh = k.reshape(B, S, num_heads, dh).transpose(0, 2, 1, 3)
    vh = v.reshape(B, S, num_heads, dh).transpose(0, 2, 1, 3)
    sc = jnp.einsum('bhqd,bhkd->bhqk', qh, kh) / jnp.sqrt(jnp.float32(dh))
    p = jax.nn.softmax(sc, axis=-1)
    ctx = jnp.einsum('bhqk,bhkd->bhqd', p, vh)
    ctx = ctx.transpose(0, 2, 1, 3).reshape(B, S, F_out)
    add_1 = ctx + q
    norm_1 = _layer_norm(add_1, params["ln1_g"], params["ln1_b"])
    h1 = jnp.maximum(jnp.einsum('bso,oe->bse', norm_1, params["w1"]) + params["b1"], 0.0)
    ff = jnp.einsum('bse,eo->bso', h1, params["w2"]) + params["b2"]
    add_2 = norm_1 + ff
    return _layer_norm(add_2, params["ln2_g"], params["ln2_b"])


def init_params(key, in_features, out_features):
    ks = jax.random.split(key, 8)
    scale_in = 1.0 / jnp.sqrt(jnp.float32(in_features))
    scale_out = 1.0 / jnp.sqrt(jnp.float32(out_features))
    p = {
        # attention projections: stored (in, out), y = x @ W + b
        "wq": jax.random.normal(ks[0], (in_features, out_features), jnp.float32) * scale_in,
        "wk": jax.random.normal(ks[1], (in_features, out_features), jnp.float32) * scale_in,
        "wv": jax.random.normal(ks[2], (in_features, out_features), jnp.float32) * scale_in,
        "bq": jax.random.normal(ks[3], (1, out_features), jnp.float32) * 0.01,
        "bk": jax.random.normal(ks[4], (1, out_features), jnp.float32) * 0.01,
        "bv": jax.random.normal(ks[5], (1, out_features), jnp.float32) * 0.01,
        # layer norms (elementwise affine, torch init: gamma=1, beta=0)
        "ln1_g": jnp.ones((1, out_features), jnp.float32),
        "ln1_b": jnp.zeros((1, out_features), jnp.float32),
        "ln2_g": jnp.ones((1, out_features), jnp.float32),
        "ln2_b": jnp.zeros((1, out_features), jnp.float32),
        # feed-forward
        "w1": jax.random.normal(ks[6], (out_features, out_features), jnp.float32) * scale_out,
        "b1": jnp.zeros((1, out_features), jnp.float32),
        "w2": jax.random.normal(ks[7], (out_features, out_features), jnp.float32) * scale_out,
        "b2": jnp.zeros((1, out_features), jnp.float32),
    }
    return p


if __name__ == "__main__":
    B, S = 2, 8
    IN_FEATURES, OUT_FEATURES, NUM_HEADS = 16, 32, 4

    key = jax.random.PRNGKey(0)
    k_x, k_p = jax.random.split(key)
    x = jax.random.normal(k_x, (B, S, IN_FEATURES), jnp.float32)
    params = init_params(k_p, IN_FEATURES, OUT_FEATURES)

    out = transformer_forward(x, params, NUM_HEADS)
    out = jax.block_until_ready(out)
    assert out.shape == (B, S, OUT_FEATURES), out.shape
    assert bool(jnp.all(jnp.isfinite(out)))

    # loose tolerance: kernel runs its matmuls in bf16, reference is pure f32
    ref = reference_forward(x, params, NUM_HEADS)
    max_err = float(jnp.max(jnp.abs(out - ref)))
    assert max_err < 1.5e-1, f"mismatch vs reference, max abs err = {max_err}"

    print("KERNEL_OK")
</pallas_src>

<mosaic_0001>
module attributes {stable_mosaic.version = 11 : i64} {
  func.func @transformer_kernel(%arg0: i32, %arg1: memref<2x8x16xf32, #tpu.memory_space<vmem>>, %arg2: memref<16x96xbf16, #tpu.memory_space<vmem>>, %arg3: memref<1x96xf32, #tpu.memory_space<vmem>>, %arg4: memref<1x32xf32, #tpu.memory_space<vmem>>, %arg5: memref<1x32xf32, #tpu.memory_space<vmem>>, %arg6: memref<32x32xbf16, #tpu.memory_space<vmem>>, %arg7: memref<1x32xf32, #tpu.memory_space<vmem>>, %arg8: memref<32x32xbf16, #tpu.memory_space<vmem>>, %arg9: memref<1x32xf32, #tpu.memory_space<vmem>>, %arg10: memref<1x32xf32, #tpu.memory_space<vmem>>, %arg11: memref<1x32xf32, #tpu.memory_space<vmem>>, %arg12: memref<2x8x32xf32, #tpu.memory_space<vmem>>, %arg13: memref<8x8x8xbf16, #tpu.memory_space<vmem>>, %arg14: memref<8x8x8xbf16, #tpu.memory_space<vmem>>, %arg15: memref<8x8x8xbf16, #tpu.memory_space<vmem>>, %arg16: memref<16x32xf32, #tpu.memory_space<vmem>>) attributes {dimension_semantics = [#tpu.dimension_semantics<parallel>], iteration_bounds = array<i64: 1>, scalar_prefetch = 0 : i64, scratch_operands = 4 : i64, tpu.core_type = #tpu.core_type<tc>, window_params = [{transform_indices = @transform_0, window_bounds = array<i64: 2, 8, 16>}, {pipeline_mode = #tpu.pipeline_mode<synchronous>, transform_indices = @transform_1, window_bounds = array<i64: 16, 96>}, {pipeline_mode = #tpu.pipeline_mode<synchronous>, transform_indices = @transform_2, window_bounds = array<i64: 1, 96>}, {pipeline_mode = #tpu.pipeline_mode<synchronous>, transform_indices = @transform_3, window_bounds = array<i64: 1, 32>}, {pipeline_mode = #tpu.pipeline_mode<synchronous>, transform_indices = @transform_4, window_bounds = array<i64: 1, 32>}, {pipeline_mode = #tpu.pipeline_mode<synchronous>, transform_indices = @transform_5, window_bounds = array<i64: 32, 32>}, {pipeline_mode = #tpu.pipeline_mode<synchronous>, transform_indices = @transform_6, window_bounds = array<i64: 1, 32>}, {pipeline_mode = #tpu.pipeline_mode<synchronous>, transform_indices = @transform_7, window_bounds = array<i64: 32, 32>}, {pipeline_mode = #tpu.pipeline_mode<synchronous>, transform_indices = @transform_8, window_bounds = array<i64: 1, 32>}, {pipeline_mode = #tpu.pipeline_mode<synchronous>, transform_indices = @transform_9, window_bounds = array<i64: 1, 32>}, {pipeline_mode = #tpu.pipeline_mode<synchronous>, transform_indices = @transform_10, window_bounds = array<i64: 1, 32>}, {transform_indices = @transform_11, window_bounds = array<i64: 2, 8, 32>}]} {
    %c0 = arith.constant 0 : index
    %c0_0 = arith.constant 0 : index
    %c0_1 = arith.constant 0 : index
    %0 = vector.load %arg1[%c0, %c0_0, %c0_1] : memref<2x8x16xf32, #tpu.memory_space<vmem>>, vector<2x8x16xf32>
    %1 = vector.shape_cast %0 : vector<2x8x16xf32> to vector<16x16xf32>
    %2 = arith.truncf %1 : vector<16x16xf32> to vector<16x16xbf16>
    %c0_2 = arith.constant 0 : index
    %c0_3 = arith.constant 0 : index
    %3 = vector.load %arg2[%c0_2, %c0_3] : memref<16x96xbf16, #tpu.memory_space<vmem>>, vector<16x96xbf16>
    %cst = arith.constant dense<0.000000e+00> : vector<16x96xf32>
    %4 = tpu.matmul %2, %3, %cst {dimension_numbers = #tpu.dot_dimension_numbers<[1], [0], [0], [1], [0, 0, 1, 1], [], []>} : vector<16x16xbf16>, vector<16x96xbf16>, vector<16x96xf32> -> vector<16x96xf32>
    %c0_4 = arith.constant 0 : index
    %c0_5 = arith.constant 0 : index
    %5 = vector.load %arg3[%c0_4, %c0_5] : memref<1x96xf32, #tpu.memory_space<vmem>>, vector<1x96xf32>
    %6 = vector.broadcast %5 : vector<1x96xf32> to vector<16x96xf32>
    %7 = arith.addf %4, %6 : vector<16x96xf32>
    %8 = vector.extract_strided_slice %7 {offsets = [0, 0], sizes = [16, 32], strides = [1, 1]} : vector<16x96xf32> to vector<16x32xf32>
    %cst_6 = arith.constant 0.353553385 : f32
    %9 = vector.broadcast %cst_6 : f32 to vector<16x32xf32>
    %10 = arith.mulf %8, %9 : vector<16x32xf32>
    %11 = arith.truncf %10 : vector<16x32xf32> to vector<16x32xbf16>
    %12 = vector.extract_strided_slice %7 {offsets = [0, 32], sizes = [16, 32], strides = [1, 1]} : vector<16x96xf32> to vector<16x32xf32>
    %13 = arith.truncf %12 : vector<16x32xf32> to vector<16x32xbf16>
    %14 = vector.extract_strided_slice %7 {offsets = [0, 64], sizes = [16, 32], strides = [1, 1]} : vector<16x96xf32> to vector<16x32xf32>
    %15 = arith.truncf %14 : vector<16x32xf32> to vector<16x32xbf16>
    %16 = vector.extract_strided_slice %11 {offsets = [0, 0], sizes = [8, 8], strides = [1, 1]} : vector<16x32xbf16> to vector<8x8xbf16>
    %c0_7 = arith.constant 0 : index
    %c0_8 = arith.constant 0 : index
    %c0_9 = arith.constant 0 : index
    %17 = vector.load %arg13[%c0_7, %c0_8, %c0_9] : memref<8x8x8xbf16, #tpu.memory_space<vmem>>, vector<1x8x8xbf16>
    %18 = vector.shape_cast %17 : vector<1x8x8xbf16> to vector<8x8xbf16>
    %19 = vector.shape_cast %16 : vector<8x8xbf16> to vector<1x8x8xbf16>
    tpu.vector_store %arg13[%c0_7, %c0_8, %c0_9], %19 {strides = array<i32>} : memref<8x8x8xbf16, #tpu.memory_space<vmem>>, vector<1x8x8xbf16>,
    %20 = vector.extract_strided_slice %13 {offsets = [0, 0], sizes = [8, 8], strides = [1, 1]} : vector<16x32xbf16> to vector<8x8xbf16>
    %c0_10 = arith.constant 0 : index
    %c0_11 = arith.constant 0 : index
    %c0_12 = arith.constant 0 : index
    %21 = vector.load %arg14[%c0_10, %c0_11, %c0_12] : memref<8x8x8xbf16, #tpu.memory_space<vmem>>, vector<1x8x8xbf16>
    %22 = vector.shape_cast %21 : vector<1x8x8xbf16> to vector<8x8xbf16>
    %23 = vector.shape_cast %20 : vector<8x8xbf16> to vector<1x8x8xbf16>
    tpu.vector_store %arg14[%c0_10, %c0_11, %c0_12], %23 {strides = array<i32>} : memref<8x8x8xbf16, #tpu.memory_space<vmem>>, vector<1x8x8xbf16>,
    %24 = vector.extract_strided_slice %15 {offsets = [0, 0], sizes = [8, 8], strides = [1, 1]} : vector<16x32xbf16> to vector<8x8xbf16>
    %c0_13 = arith.constant 0 : index
    %c0_14 = arith.constant 0 : index
    %c0_15 = arith.constant 0 : index
    %25 = vector.load %arg15[%c0_13, %c0_14, %c0_15] : memref<8x8x8xbf16, #tpu.memory_space<vmem>>, vector<1x8x8xbf16>
    %26 = vector.shape_cast %25 : vector<1x8x8xbf16> to vector<8x8xbf16>
    %27 = vector.shape_cast %24 : vector<8x8xbf16> to vector<1x8x8xbf16>
    tpu.vector_store %arg15[%c0_13, %c0_14, %c0_15], %27 {strides = array<i32>} : memref<8x8x8xbf16, #tpu.memory_space<vmem>>, vector<1x8x8xbf16>,
    %28 = vector.extract_strided_slice %11 {offsets = [0, 8], sizes = [8, 8], strides = [1, 1]} : vector<16x32xbf16> to vector<8x8xbf16>
    %c1 = arith.constant 1 : index
    %c0_16 = arith.constant 0 : index
    %c0_17 = arith.constant 0 : index
    %29 = vector.load %arg13[%c1, %c0_16, %c0_17] : memref<8x8x8xbf16, #tpu.memory_space<vmem>>, vector<1x8x8xbf16>
    %30 = vector.shape_cast %29 : vector<1x8x8xbf16> to vector<8x8xbf16>
    %31 = vector.shape_cast %28 : vector<8x8xbf16> to vector<1x8x8xbf16>
    tpu.vector_store %arg13[%c1, %c0_16, %c0_17], %31 {strides = array<i32>} : memref<8x8x8xbf16, #tpu.memory_space<vmem>>, vector<1x8x8xbf16>,
    %32 = vector.extract_strided_slice %13 {offsets = [0, 8], sizes = [8, 8], strides = [1, 1]} : vector<16x32xbf16> to vector<8x8xbf16>
    %c1_18 = arith.constant 1 : index
    %c0_19 = arith.constant 0 : index
    %c0_20 = arith.constant 0 : index
    %33 = vector.load %arg14[%c1_18, %c0_19, %c0_20] : memref<8x8x8xbf16, #tpu.memory_space<vmem>>, vector<1x8x8xbf16>
    %34 = vector.shape_cast %33 : vector<1x8x8xbf16> to vector<8x8xbf16>
    %35 = vector.shape_cast %32 : vector<8x8xbf16> to vector<1x8x8xbf16>
    tpu.vector_store %arg14[%c1_18, %c0_19, %c0_20], %35 {strides = array<i32>} : memref<8x8x8xbf16, #tpu.memory_space<vmem>>, vector<1x8x8xbf16>,
    %36 = vector.extract_strided_slice %15 {offsets = [0, 8], sizes = [8, 8], strides = [1, 1]} : vector<16x32xbf16> to vector<8x8xbf16>
    %c1_21 = arith.constant 1 : index
    %c0_22 = arith.constant 0 : index
    %c0_23 = arith.constant 0 : index
    %37 = vector.load %arg15[%c1_21, %c0_22, %c0_23] : memref<8x8x8xbf16, #tpu.memory_space<vmem>>, vector<1x8x8xbf16>
    %38 = vector.shape_cast %37 : vector<1x8x8xbf16> to vector<8x8xbf16>
    %39 = vector.shape_cast %36 : vector<8x8xbf16> to vector<1x8x8xbf16>
    tpu.vector_store %arg15[%c1_21, %c0_22, %c0_23], %39 {strides = array<i32>} : memref<8x8x8xbf16, #tpu.memory_space<vmem>>, vector<1x8x8xbf16>,
    %40 = vector.extract_strided_slice %11 {offsets = [0, 16], sizes = [8, 8], strides = [1, 1]} : vector<16x32xbf16> to vector<8x8xbf16>
    %c2 = arith.constant 2 : index
    %c0_24 = arith.constant 0 : index
    %c0_25 = arith.constant 0 : index
    %41 = vector.load %arg13[%c2, %c0_24, %c0_25] : memref<8x8x8xbf16, #tpu.memory_space<vmem>>, vector<1x8x8xbf16>
    %42 = vector.shape_cast %41 : vector<1x8x8xbf16> to vector<8x8xbf16>
    %43 = vector.shape_cast %40 : vector<8x8xbf16> to vector<1x8x8xbf16>
    tpu.vector_store %arg13[%c2, %c0_24, %c0_25], %43 {strides = array<i32>} : memref<8x8x8xbf16, #tpu.memory_space<vmem>>, vector<1x8x8xbf16>,
    %44 = vector.extract_strided_slice %13 {offsets = [0, 16], sizes = [8, 8], strides = [1, 1]} : vector<16x32xbf16> to vector<8x8xbf16>
    %c2_26 = arith.constant 2 : index
    %c0_27 = arith.constant 0 : index
    %c0_28 = arith.constant 0 : index
    %45 = vector.load %arg14[%c2_26, %c0_27, %c0_28] : memref<8x8x8xbf16, #tpu.memory_space<vmem>>, vector<1x8x8xbf16>
    %46 = vector.shape_cast %45 : vector<1x8x8xbf16> to vector<8x8xbf16>
    %47 = vector.shape_cast %44 : vector<8x8xbf16> to vector<1x8x8xbf16>
    tpu.vector_store %arg14[%c2_26, %c0_27, %c0_28], %47 {strides = array<i32>} : memref<8x8x8xbf16, #tpu.memory_space<vmem>>, vector<1x8x8xbf16>,
    %48 = vector.extract_strided_slice %15 {offsets = [0, 16], sizes = [8, 8], strides = [1, 1]} : vector<16x32xbf16> to vector<8x8xbf16>
    %c2_29 = arith.constant 2 : index
    %c0_30 = arith.constant 0 : index
    %c0_31 = arith.constant 0 : index
    %49 = vector.load %arg15[%c2_29, %c0_30, %c0_31] : memref<8x8x8xbf16, #tpu.memory_space<vmem>>, vector<1x8x8xbf16>
    %50 = vector.shape_cast %49 : vector<1x8x8xbf16> to vector<8x8xbf16>
    %51 = vector.shape_cast %48 : vector<8x8xbf16> to vector<1x8x8xbf16>
    tpu.vector_store %arg15[%c2_29, %c0_30, %c0_31], %51 {strides = array<i32>} : memref<8x8x8xbf16, #tpu.memory_space<vmem>>, vector<1x8x8xbf16>,
    %52 = vector.extract_strided_slice %11 {offsets = [0, 24], sizes = [8, 8], strides = [1, 1]} : vector<16x32xbf16> to vector<8x8xbf16>
    %c3 = arith.constant 3 : index
    %c0_32 = arith.constant 0 : index
    %c0_33 = arith.constant 0 : index
    %53 = vector.load %arg13[%c3, %c0_32, %c0_33] : memref<8x8x8xbf16, #tpu.memory_space<vmem>>, vector<1x8x8xbf16>
    %54 = vector.shape_cast %53 : vector<1x8x8xbf16> to vector<8x8xbf16>
    %55 = vector.shape_cast %52 : vector<8x8xbf16> to vector<1x8x8xbf16>
    tpu.vector_store %arg13[%c3, %c0_32, %c0_33], %55 {strides = array<i32>} : memref<8x8x8xbf16, #tpu.memory_space<vmem>>, vector<1x8x8xbf16>,
    %56 = vector.extract_strided_slice %13 {offsets = [0, 24], sizes = [8, 8], strides = [1, 1]} : vector<16x32xbf16> to vector<8x8xbf16>
    %c3_34 = arith.constant 3 : index
    %c0_35 = arith.constant 0 : index
    %c0_36 = arith.constant 0 : index
    %57 = vector.load %arg14[%c3_34, %c0_35, %c0_36] : memref<8x8x8xbf16, #tpu.memory_space<vmem>>, vector<1x8x8xbf16>
    %58 = vector.shape_cast %57 : vector<1x8x8xbf16> to vector<8x8xbf16>
    %59 = vector.shape_cast %56 : vector<8x8xbf16> to vector<1x8x8xbf16>
    tpu.vector_store %arg14[%c3_34, %c0_35, %c0_36], %59 {strides = array<i32>} : memref<8x8x8xbf16, #tpu.memory_space<vmem>>, vector<1x8x8xbf16>,
    %60 = vector.extract_strided_slice %15 {offsets = [0, 24], sizes = [8, 8], strides = [1, 1]} : vector<16x32xbf16> to vector<8x8xbf16>
    %c3_37 = arith.constant 3 : index
    %c0_38 = arith.constant 0 : index
    %c0_39 = arith.constant 0 : index
    %61 = vector.load %arg15[%c3_37, %c0_38, %c0_39] : memref<8x8x8xbf16, #tpu.memory_space<vmem>>, vector<1x8x8xbf16>
    %62 = vector.shape_cast %61 : vector<1x8x8xbf16> to vector<8x8xbf16>
    %63 = vector.shape_cast %60 : vector<8x8xbf16> to vector<1x8x8xbf16>
    tpu.vector_store %arg15[%c3_37, %c0_38, %c0_39], %63 {strides = array<i32>} : memref<8x8x8xbf16, #tpu.memory_space<vmem>>, vector<1x8x8xbf16>,
    %64 = vector.extract_strided_slice %11 {offsets = [8, 0], sizes = [8, 8], strides = [1, 1]} : vector<16x32xbf16> to vector<8x8xbf16>
    %c4 = arith.constant 4 : index
    %c0_40 = arith.constant 0 : index
    %c0_41 = arith.constant 0 : index
    %65 = vector.load %arg13[%c4, %c0_40, %c0_41] : memref<8x8x8xbf16, #tpu.memory_space<vmem>>, vector<1x8x8xbf16>
    %66 = vector.shape_cast %65 : vector<1x8x8xbf16> to vector<8x8xbf16>
    %67 = vector.shape_cast %64 : vector<8x8xbf16> to vector<1x8x8xbf16>
    tpu.vector_store %arg13[%c4, %c0_40, %c0_41], %67 {strides = array<i32>} : memref<8x8x8xbf16, #tpu.memory_space<vmem>>, vector<1x8x8xbf16>,
    %68 = vector.extract_strided_slice %13 {offsets = [8, 0], sizes = [8, 8], strides = [1, 1]} : vector<16x32xbf16> to vector<8x8xbf16>
    %c4_42 = arith.constant 4 : index
    %c0_43 = arith.constant 0 : index
    %c0_44 = arith.constant 0 : index
    %69 = vector.load %arg14[%c4_42, %c0_43, %c0_44] : memref<8x8x8xbf16, #tpu.memory_space<vmem>>, vector<1x8x8xbf16>
    %70 = vector.shape_cast %69 : vector<1x8x8xbf16> to vector<8x8xbf16>
    %71 = vector.shape_cast %68 : vector<8x8xbf16> to vector<1x8x8xbf16>
    tpu.vector_store %arg14[%c4_42, %c0_43, %c0_44], %71 {strides = array<i32>} : memref<8x8x8xbf16, #tpu.memory_space<vmem>>, vector<1x8x8xbf16>,
    %72 = vector.extract_strided_slice %15 {offsets = [8, 0], sizes = [8, 8], strides = [1, 1]} : vector<16x32xbf16> to vector<8x8xbf16>
    %c4_45 = arith.constant 4 : index
    %c0_46 = arith.constant 0 : index
    %c0_47 = arith.constant 0 : index
    %73 = vector.load %arg15[%c4_45, %c0_46, %c0_47] : memref<8x8x8xbf16, #tpu.memory_space<vmem>>, vector<1x8x8xbf16>
    %74 = vector.shape_cast %73 : vector<1x8x8xbf16> to vector<8x8xbf16>
    %75 = vector.shape_cast %72 : vector<8x8xbf16> to vector<1x8x8xbf16>
    tpu.vector_store %arg15[%c4_45, %c0_46, %c0_47], %75 {strides = array<i32>} : memref<8x8x8xbf16, #tpu.memory_space<vmem>>, vector<1x8x8xbf16>,
    %76 = vector.extract_strided_slice %11 {offsets = [8, 8], sizes = [8, 8], strides = [1, 1]} : vector<16x32xbf16> to vector<8x8xbf16>
    %c5 = arith.constant 5 : index
    %c0_48 = arith.constant 0 : index
    %c0_49 = arith.constant 0 : index
    %77 = vector.load %arg13[%c5, %c0_48, %c0_49] : memref<8x8x8xbf16, #tpu.memory_space<vmem>>, vector<1x8x8xbf16>
    %78 = vector.shape_cast %77 : vector<1x8x8xbf16> to vector<8x8xbf16>
    %79 = vector.shape_cast %76 : vector<8x8xbf16> to vector<1x8x8xbf16>
    tpu.vector_store %arg13[%c5, %c0_48, %c0_49], %79 {strides = array<i32>} : memref<8x8x8xbf16, #tpu.memory_space<vmem>>, vector<1x8x8xbf16>,
    %80 = vector.extract_strided_slice %13 {offsets = [8, 8], sizes = [8, 8], strides = [1, 1]} : vector<16x32xbf16> to vector<8x8xbf16>
    %c5_50 = arith.constant 5 : index
    %c0_51 = arith.constant 0 : index
    %c0_52 = arith.constant 0 : index
    %81 = vector.load %arg14[%c5_50, %c0_51, %c0_52] : memref<8x8x8xbf16, #tpu.memory_space<vmem>>, vector<1x8x8xbf16>
    %82 = vector.shape_cast %81 : vector<1x8x8xbf16> to vector<8x8xbf16>
    %83 = vector.shape_cast %80 : vector<8x8xbf16> to vector<1x8x8xbf16>
    tpu.vector_store %arg14[%c5_50, %c0_51, %c0_52], %83 {strides = array<i32>} : memref<8x8x8xbf16, #tpu.memory_space<vmem>>, vector<1x8x8xbf16>,
    %84 = vector.extract_strided_slice %15 {offsets = [8, 8], sizes = [8, 8], strides = [1, 1]} : vector<16x32xbf16> to vector<8x8xbf16>
    %c5_53 = arith.constant 5 : index
    %c0_54 = arith.constant 0 : index
    %c0_55 = arith.constant 0 : index
    %85 = vector.load %arg15[%c5_53, %c0_54, %c0_55] : memref<8x8x8xbf16, #tpu.memory_space<vmem>>, vector<1x8x8xbf16>
    %86 = vector.shape_cast %85 : vector<1x8x8xbf16> to vector<8x8xbf16>
    %87 = vector.shape_cast %84 : vector<8x8xbf16> to vector<1x8x8xbf16>
    tpu.vector_store %arg15[%c5_53, %c0_54, %c0_55], %87 {strides = array<i32>} : memref<8x8x8xbf16, #tpu.memory_space<vmem>>, vector<1x8x8xbf16>,
    %88 = vector.extract_strided_slice %11 {offsets = [8, 16], sizes = [8, 8], strides = [1, 1]} : vector<16x32xbf16> to vector<8x8xbf16>
    %c6 = arith.constant 6 : index
    %c0_56 = arith.constant 0 : index
    %c0_57 = arith.constant 0 : index
    %89 = vector.load %arg13[%c6, %c0_56, %c0_57] : memref<8x8x8xbf16, #tpu.memory_space<vmem>>, vector<1x8x8xbf16>
    %90 = vector.shape_cast %89 : vector<1x8x8xbf16> to vector<8x8xbf16>
    %91 = vector.shape_cast %88 : vector<8x8xbf16> to vector<1x8x8xbf16>
    tpu.vector_store %arg13[%c6, %c0_56, %c0_57], %91 {strides = array<i32>} : memref<8x8x8xbf16, #tpu.memory_space<vmem>>, vector<1x8x8xbf16>,
    %92 = vector.extract_strided_slice %13 {offsets = [8, 16], sizes = [8, 8], strides = [1, 1]} : vector<16x32xbf16> to vector<8x8xbf16>
    %c6_58 = arith.constant 6 : index
    %c0_59 = arith.constant 0 : index
    %c0_60 = arith.constant 0 : index
    %93 = vector.load %arg14[%c6_58, %c0_59, %c0_60] : memref<8x8x8xbf16, #tpu.memory_space<vmem>>, vector<1x8x8xbf16>
    %94 = vector.shape_cast %93 : vector<1x8x8xbf16> to vector<8x8xbf16>
    %95 = vector.shape_cast %92 : vector<8x8xbf16> to vector<1x8x8xbf16>
    tpu.vector_store %arg14[%c6_58, %c0_59, %c0_60], %95 {strides = array<i32>} : memref<8x8x8xbf16, #tpu.memory_space<vmem>>, vector<1x8x8xbf16>,
    %96 = vector.extract_strided_slice %15 {offsets = [8, 16], sizes = [8, 8], strides = [1, 1]} : vector<16x32xbf16> to vector<8x8xbf16>
    %c6_61 = arith.constant 6 : index
    %c0_62 = arith.constant 0 : index
    %c0_63 = arith.constant 0 : index
    %97 = vector.load %arg15[%c6_61, %c0_62, %c0_63] : memref<8x8x8xbf16, #tpu.memory_space<vmem>>, vector<1x8x8xbf16>
    %98 = vector.shape_cast %97 : vector<1x8x8xbf16> to vector<8x8xbf16>
    %99 = vector.shape_cast %96 : vector<8x8xbf16> to vector<1x8x8xbf16>
    tpu.vector_store %arg15[%c6_61, %c0_62, %c0_63], %99 {strides = array<i32>} : memref<8x8x8xbf16, #tpu.memory_space<vmem>>, vector<1x8x8xbf16>,
    %100 = vector.extract_strided_slice %11 {offsets = [8, 24], sizes = [8, 8], strides = [1, 1]} : vector<16x32xbf16> to vector<8x8xbf16>
    %c7 = arith.constant 7 : index
    %c0_64 = arith.constant 0 : index
    %c0_65 = arith.constant 0 : index
    %101 = vector.load %arg13[%c7, %c0_64, %c0_65] : memref<8x8x8xbf16, #tpu.memory_space<vmem>>, vector<1x8x8xbf16>
    %102 = vector.shape_cast %101 : vector<1x8x8xbf16> to vector<8x8xbf16>
    %103 = vector.shape_cast %100 : vector<8x8xbf16> to vector<1x8x8xbf16>
    tpu.vector_store %arg13[%c7, %c0_64, %c0_65], %103 {strides = array<i32>} : memref<8x8x8xbf16, #tpu.memory_space<vmem>>, vector<1x8x8xbf16>,
    %104 = vector.extract_strided_slice %13 {offsets = [8, 24], sizes = [8, 8], strides = [1, 1]} : vector<16x32xbf16> to vector<8x8xbf16>
    %c7_66 = arith.constant 7 : index
    %c0_67 = arith.constant 0 : index
    %c0_68 = arith.constant 0 : index
    %105 = vector.load %arg14[%c7_66, %c0_67, %c0_68] : memref<8x8x8xbf16, #tpu.memory_space<vmem>>, vector<1x8x8xbf16>
    %106 = vector.shape_cast %105 : vector<1x8x8xbf16> to vector<8x8xbf16>
    %107 = vector.shape_cast %104 : vector<8x8xbf16> to vector<1x8x8xbf16>
    tpu.vector_store %arg14[%c7_66, %c0_67, %c0_68], %107 {strides = array<i32>} : memref<8x8x8xbf16, #tpu.memory_space<vmem>>, vector<1x8x8xbf16>,
    %108 = vector.extract_strided_slice %15 {offsets = [8, 24], sizes = [8, 8], strides = [1, 1]} : vector<16x32xbf16> to vector<8x8xbf16>
    %c7_69 = arith.constant 7 : index
    %c0_70 = arith.constant 0 : index
    %c0_71 = arith.constant 0 : index
    %109 = vector.load %arg15[%c7_69, %c0_70, %c0_71] : memref<8x8x8xbf16, #tpu.memory_space<vmem>>, vector<1x8x8xbf16>
    %110 = vector.shape_cast %109 : vector<1x8x8xbf16> to vector<8x8xbf16>
    %111 = vector.shape_cast %108 : vector<8x8xbf16> to vector<1x8x8xbf16>
    tpu.vector_store %arg15[%c7_69, %c0_70, %c0_71], %111 {strides = array<i32>} : memref<8x8x8xbf16, #tpu.memory_space<vmem>>, vector<1x8x8xbf16>,
    %c0_72 = arith.constant 0 : index
    %c0_73 = arith.constant 0 : index
    %c0_74 = arith.constant 0 : index
    %112 = vector.load %arg13[%c0_72, %c0_73, %c0_74] : memref<8x8x8xbf16, #tpu.memory_space<vmem>>, vector<8x8x8xbf16>
    %c0_75 = arith.constant 0 : index
    %c0_76 = arith.constant 0 : index
    %c0_77 = arith.constant 0 : index
    %113 = vector.load %arg14[%c0_75, %c0_76, %c0_77] : memref<8x8x8xbf16, #tpu.memory_space<vmem>>, vector<8x8x8xbf16>
    %c0_78 = arith.constant 0 : index
    %c0_79 = arith.constant 0 : index
    %c0_80 = arith.constant 0 : index
    %114 = vector.load %arg15[%c0_78, %c0_79, %c0_80] : memref<8x8x8xbf16, #tpu.memory_space<vmem>>, vector<8x8x8xbf16>
    "tpu.trace_start"() <{level = 10 : i32, message = "gqd,gkd->gqk"}> : () -> ()
    %cst_81 = arith.constant dense<0.000000e+00> : vector<8x8x8xf32>
    %115 = tpu.matmul %112, %113, %cst_81 {dimension_numbers = #tpu.dot_dimension_numbers<[2], [2], [1], [1], [0, 0, 0, 1, 1, 1], [0], [0]>} : vector<8x8x8xbf16>, vector<8x8x8xbf16>, vector<8x8x8xf32> -> vector<8x8x8xf32>
    "tpu.trace_stop"() : () -> ()
    %cst_82 = arith.constant dense<0xFF800000> : vector<8x8xf32>
    %116 = vector.multi_reduction <maximumf>, %115, %cst_82 [2] : vector<8x8x8xf32> to vector<8x8xf32>
    %117 = vector.shape_cast %116 : vector<8x8xf32> to vector<8x8x1xf32>
    %118 = vector.broadcast %117 : vector<8x8x1xf32> to vector<8x8x8xf32>
    %119 = arith.subf %115, %118 : vector<8x8x8xf32>
    %120 = math.exp %119 : vector<8x8x8xf32>
    %cst_83 = arith.constant dense<0.000000e+00> : vector<8x8xf32>
    %121 = vector.multi_reduction <add>, %120, %cst_83 [2] : vector<8x8x8xf32> to vector<8x8xf32>
    %122 = vector.shape_cast %121 : vector<8x8xf32> to vector<8x8x1xf32>
    %123 = tpu.reciprocal %122 {approx = true} : vector<8x8x1xf32> -> vector<8x8x1xf32>
    %124 = vector.broadcast %123 : vector<8x8x1xf32> to vector<8x8x8xf32>
    %125 = arith.mulf %120, %124 : vector<8x8x8xf32>
    %126 = arith.truncf %125 : vector<8x8x8xf32> to vector<8x8x8xbf16>
    "tpu.trace_start"() <{level = 10 : i32, message = "gqk,gkd->gqd"}> : () -> ()
    %cst_84 = arith.constant dense<0.000000e+00> : vector<8x8x8xf32>
    %127 = tpu.matmul %126, %114, %cst_84 {dimension_numbers = #tpu.dot_dimension_numbers<[2], [1], [1], [2], [0, 0, 0, 1, 1, 2], [0], [0]>} : vector<8x8x8xbf16>, vector<8x8x8xbf16>, vector<8x8x8xf32> -> vector<8x8x8xf32>
    "tpu.trace_stop"() : () -> ()
    %128 = vector.extract_strided_slice %127 {offsets = [0, 0, 0], sizes = [1, 8, 8], strides = [1, 1, 1]} : vector<8x8x8xf32> to vector<1x8x8xf32>
    %129 = vector.shape_cast %128 : vector<1x8x8xf32> to vector<8x8xf32>
    %c0_85 = arith.constant 0 : index
    %c0_86 = arith.constant 0 : index
    %130 = vector.load %arg16[%c0_85, %c0_86] : memref<16x32xf32, #tpu.memory_space<vmem>>, vector<8x8xf32>
    tpu.vector_store %arg16[%c0_85, %c0_86], %129 {strides = array<i32>} : memref<16x32xf32, #tpu.memory_space<vmem>>, vector<8x8xf32>,
    %131 = vector.extract_strided_slice %127 {offsets = [1, 0, 0], sizes = [1, 8, 8], strides = [1, 1, 1]} : vector<8x8x8xf32> to vector<1x8x8xf32>
    %132 = vector.shape_cast %131 : vector<1x8x8xf32> to vector<8x8xf32>
    %c0_87 = arith.constant 0 : index
    %c8 = arith.constant 8 : index
    %133 = vector.load %arg16[%c0_87, %c8] : memref<16x32xf32, #tpu.memory_space<vmem>>, vector<8x8xf32>
    tpu.vector_store %arg16[%c0_87, %c8], %132 {strides = array<i32>} : memref<16x32xf32, #tpu.memory_space<vmem>>, vector<8x8xf32>,
    %134 = vector.extract_strided_slice %127 {offsets = [2, 0, 0], sizes = [1, 8, 8], strides = [1, 1, 1]} : vector<8x8x8xf32> to vector<1x8x8xf32>
    %135 = vector.shape_cast %134 : vector<1x8x8xf32> to vector<8x8xf32>
    %c0_88 = arith.constant 0 : index
    %c16 = arith.constant 16 : index
    %136 = vector.load %arg16[%c0_88, %c16] : memref<16x32xf32, #tpu.memory_space<vmem>>, vector<8x8xf32>
    tpu.vector_store %arg16[%c0_88, %c16], %135 {strides = array<i32>} : memref<16x32xf32, #tpu.memory_space<vmem>>, vector<8x8xf32>,
    %137 = vector.extract_strided_slice %127 {offsets = [3, 0, 0], sizes = [1, 8, 8], strides = [1, 1, 1]} : vector<8x8x8xf32> to vector<1x8x8xf32>
    %138 = vector.shape_cast %137 : vector<1x8x8xf32> to vector<8x8xf32>
    %c0_89 = arith.constant 0 : index
    %c24 = arith.constant 24 : index
    %139 = vector.load %arg16[%c0_89, %c24] : memref<16x32xf32, #tpu.memory_space<vmem>>, vector<8x8xf32>
    tpu.vector_store %arg16[%c0_89, %c24], %138 {strides = array<i32>} : memref<16x32xf32, #tpu.memory_space<vmem>>, vector<8x8xf32>,
    %140 = vector.extract_strided_slice %127 {offsets = [4, 0, 0], sizes = [1, 8, 8], strides = [1, 1, 1]} : vector<8x8x8xf32> to vector<1x8x8xf32>
    %141 = vector.shape_cast %140 : vector<1x8x8xf32> to vector<8x8xf32>
    %c8_90 = arith.constant 8 : index
    %c0_91 = arith.constant 0 : index
    %142 = vector.load %arg16[%c8_90, %c0_91] : memref<16x32xf32, #tpu.memory_space<vmem>>, vector<8x8xf32>
    tpu.vector_store %arg16[%c8_90, %c0_91], %141 {strides = array<i32>} : memref<16x32xf32, #tpu.memory_space<vmem>>, vector<8x8xf32>,
    %143 = vector.extract_strided_slice %127 {offsets = [5, 0, 0], sizes = [1, 8, 8], strides = [1, 1, 1]} : vector<8x8x8xf32> to vector<1x8x8xf32>
    %144 = vector.shape_cast %143 : vector<1x8x8xf32> to vector<8x8xf32>
    %c8_92 = arith.constant 8 : index
    %c8_93 = arith.constant 8 : index
    %145 = vector.load %arg16[%c8_92, %c8_93] : memref<16x32xf32, #tpu.memory_space<vmem>>, vector<8x8xf32>
    tpu.vector_store %arg16[%c8_92, %c8_93], %144 {strides = array<i32>} : memref<16x32xf32, #tpu.memory_space<vmem>>, vector<8x8xf32>,
    %146 = vector.extract_strided_slice %127 {offsets = [6, 0, 0], sizes = [1, 8, 8], strides = [1, 1, 1]} : vector<8x8x8xf32> to vector<1x8x8xf32>
    %147 = vector.shape_cast %146 : vector<1x8x8xf32> to vector<8x8xf32>
    %c8_94 = arith.constant 8 : index
    %c16_95 = arith.constant 16 : index
    %148 = vector.load %arg16[%c8_94, %c16_95] : memref<16x32xf32, #tpu.memory_space<vmem>>, vector<8x8xf32>
    tpu.vector_store %arg16[%c8_94, %c16_95], %147 {strides = array<i32>} : memref<16x32xf32, #tpu.memory_space<vmem>>, vector<8x8xf32>,
    %149 = vector.extract_strided_slice %127 {offsets = [7, 0, 0], sizes = [1, 8, 8], strides = [1, 1, 1]} : vector<8x8x8xf32> to vector<1x8x8xf32>
    %150 = vector.shape_cast %149 : vector<1x8x8xf32> to vector<8x8xf32>
    %c8_96 = arith.constant 8 : index
    %c24_97 = arith.constant 24 : index
    %151 = vector.load %arg16[%c8_96, %c24_97] : memref<16x32xf32, #tpu.memory_space<vmem>>, vector<8x8xf32>
    tpu.vector_store %arg16[%c8_96, %c24_97], %150 {strides = array<i32>} : memref<16x32xf32, #tpu.memory_space<vmem>>, vector<8x8xf32>,
    %c0_98 = arith.constant 0 : index
    %c0_99 = arith.constant 0 : index
    %152 = vector.load %arg16[%c0_98, %c0_99] : memref<16x32xf32, #tpu.memory_space<vmem>>, vector<16x32xf32>
    %153 = arith.addf %152, %8 : vector<16x32xf32>
    %c0_100 = arith.constant 0 : index
    %c0_101 = arith.constant 0 : index
    %154 = vector.load %arg4[%c0_100, %c0_101] : memref<1x32xf32, #tpu.memory_space<vmem>>, vector<1x32xf32>
    %c0_102 = arith.constant 0 : index
    %c0_103 = arith.constant 0 : index
    %155 = vector.load %arg5[%c0_102, %c0_103] : memref<1x32xf32, #tpu.memory_space<vmem>>, vector<1x32xf32>
    %cst_104 = arith.constant dense<0.000000e+00> : vector<16xf32>
    %156 = vector.multi_reduction <add>, %153, %cst_104 [1] : vector<16x32xf32> to vector<16xf32>
    %157 = vector.shape_cast %156 : vector<16xf32> to vector<16x1xf32>
    %cst_105 = arith.constant 3.200000e+01 : f32
    %158 = vector.broadcast %cst_105 : f32 to vector<16x1xf32>
    %159 = arith.divf %157, %158 : vector<16x1xf32>
    %160 = vector.broadcast %159 : vector<16x1xf32> to vector<16x32xf32>
    %161 = arith.subf %153, %160 : vector<16x32xf32>
    %162 = arith.mulf %161, %161 : vector<16x32xf32>
    %cst_106 = arith.constant dense<0.000000e+00> : vector<16xf32>
    %163 = vector.multi_reduction <add>, %162, %cst_106 [1] : vector<16x32xf32> to vector<16xf32>
    %164 = vector.shape_cast %163 : vector<16xf32> to vector<16x1xf32>
    %cst_107 = arith.constant 3.200000e+01 : f32
    %165 = vector.broadcast %cst_107 : f32 to vector<16x1xf32>
    %166 = arith.divf %164, %165 : vector<16x1xf32>
    %167 = vector.broadcast %159 : vector<16x1xf32> to vector<16x32xf32>
    %168 = arith.subf %153, %167 : vector<16x32xf32>
    %cst_108 = arith.constant 9.99999974E-6 : f32
    %169 = vector.broadcast %cst_108 : f32 to vector<16x1xf32>
    %170 = arith.addf %166, %169 : vector<16x1xf32>
    %171 = math.rsqrt %170 : vector<16x1xf32>
    %172 = vector.broadcast %171 : vector<16x1xf32> to vector<16x32xf32>
    %173 = arith.mulf %168, %172 : vector<16x32xf32>
    %174 = vector.broadcast %154 : vector<1x32xf32> to vector<16x32xf32>
    %175 = arith.mulf %173, %174 : vector<16x32xf32>
    %176 = vector.broadcast %155 : vector<1x32xf32> to vector<16x32xf32>
    %177 = arith.addf %175, %176 : vector<16x32xf32>
    %178 = arith.truncf %177 : vector<16x32xf32> to vector<16x32xbf16>
    %c0_109 = arith.constant 0 : index
    %c0_110 = arith.constant 0 : index
    %179 = vector.load %arg6[%c0_109, %c0_110] : memref<32x32xbf16, #tpu.memory_space<vmem>>, vector<32x32xbf16>
    %cst_111 = arith.constant dense<0.000000e+00> : vector<16x32xf32>
    %180 = tpu.matmul %178, %179, %cst_111 {dimension_numbers = #tpu.dot_dimension_numbers<[1], [0], [0], [1], [0, 0, 1, 1], [], []>} : vector<16x32xbf16>, vector<32x32xbf16>, vector<16x32xf32> -> vector<16x32xf32>
    %c0_112 = arith.constant 0 : index
    %c0_113 = arith.constant 0 : index
    %181 = vector.load %arg7[%c0_112, %c0_113] : memref<1x32xf32, #tpu.memory_space<vmem>>, vector<1x32xf32>
    %182 = vector.broadcast %181 : vector<1x32xf32> to vector<16x32xf32>
    %183 = arith.addf %180, %182 : vector<16x32xf32>
    %cst_114 = arith.constant 0.000000e+00 : f32
    %184 = vector.broadcast %cst_114 : f32 to vector<16x32xf32>
    %185 = arith.maximumf %183, %184 : vector<16x32xf32>
    %186 = arith.truncf %185 : vector<16x32xf32> to vector<16x32xbf16>
    %c0_115 = arith.constant 0 : index
    %c0_116 = arith.constant 0 : index
    %187 = vector.load %arg8[%c0_115, %c0_116] : memref<32x32xbf16, #tpu.memory_space<vmem>>, vector<32x32xbf16>
    %cst_117 = arith.constant dense<0.000000e+00> : vector<16x32xf32>
    %188 = tpu.matmul %186, %187, %cst_117 {dimension_numbers = #tpu.dot_dimension_numbers<[1], [0], [0], [1], [0, 0, 1, 1], [], []>} : vector<16x32xbf16>, vector<32x32xbf16>, vector<16x32xf32> -> vector<16x32xf32>
    %c0_118 = arith.constant 0 : index
    %c0_119 = arith.constant 0 : index
    %189 = vector.load %arg9[%c0_118, %c0_119] : memref<1x32xf32, #tpu.memory_space<vmem>>, vector<1x32xf32>
    %190 = vector.broadcast %189 : vector<1x32xf32> to vector<16x32xf32>
    %191 = arith.addf %188, %190 : vector<16x32xf32>
    %192 = arith.addf %177, %191 : vector<16x32xf32>
    %c0_120 = arith.constant 0 : index
    %c0_121 = arith.constant 0 : index
    %193 = vector.load %arg10[%c0_120, %c0_121] : memref<1x32xf32, #tpu.memory_space<vmem>>, vector<1x32xf32>
    %c0_122 = arith.constant 0 : index
    %c0_123 = arith.constant 0 : index
    %194 = vector.load %arg11[%c0_122, %c0_123] : memref<1x32xf32, #tpu.memory_space<vmem>>, vector<1x32xf32>
    %cst_124 = arith.constant dense<0.000000e+00> : vector<16xf32>
    %195 = vector.multi_reduction <add>, %192, %cst_124 [1] : vector<16x32xf32> to vector<16xf32>
    %196 = vector.shape_cast %195 : vector<16xf32> to vector<16x1xf32>
    %cst_125 = arith.constant 3.200000e+01 : f32
    %197 = vector.broadcast %cst_125 : f32 to vector<16x1xf32>
    %198 = arith.divf %196, %197 : vector<16x1xf32>
    %199 = vector.broadcast %198 : vector<16x1xf32> to vector<16x32xf32>
    %200 = arith.subf %192, %199 : vector<16x32xf32>
    %201 = arith.mulf %200, %200 : vector<16x32xf32>
    %cst_126 = arith.constant dense<0.000000e+00> : vector<16xf32>
    %202 = vector.multi_reduction <add>, %201, %cst_126 [1] : vector<16x32xf32> to vector<16xf32>
    %203 = vector.shape_cast %202 : vector<16xf32> to vector<16x1xf32>
    %cst_127 = arith.constant 3.200000e+01 : f32
    %204 = vector.broadcast %cst_127 : f32 to vector<16x1xf32>
    %205 = arith.divf %203, %204 : vector<16x1xf32>
    %206 = vector.broadcast %198 : vector<16x1xf32> to vector<16x32xf32>
    %207 = arith.subf %192, %206 : vector<16x32xf32>
    %cst_128 = arith.constant 9.99999974E-6 : f32
    %208 = vector.broadcast %cst_128 : f32 to vector<16x1xf32>
    %209 = arith.addf %205, %208 : vector<16x1xf32>
    %210 = math.rsqrt %209 : vector<16x1xf32>
    %211 = vector.broadcast %210 : vector<16x1xf32> to vector<16x32xf32>
    %212 = arith.mulf %207, %211 : vector<16x32xf32>
    %213 = vector.broadcast %193 : vector<1x32xf32> to vector<16x32xf32>
    %214 = arith.mulf %212, %213 : vector<16x32xf32>
    %215 = vector.broadcast %194 : vector<1x32xf32> to vector<16x32xf32>
    %216 = arith.addf %214, %215 : vector<16x32xf32>
    %217 = vector.shape_cast %216 : vector<16x32xf32> to vector<2x8x32xf32>
    %c0_129 = arith.constant 0 : index
    %c0_130 = arith.constant 0 : index
    %c0_131 = arith.constant 0 : index
    %218 = vector.load %arg12[%c0_129, %c0_130, %c0_131] : memref<2x8x32xf32, #tpu.memory_space<vmem>>, vector<2x8x32xf32>
    tpu.vector_store %arg12[%c0_129, %c0_130, %c0_131], %217 {strides = array<i32>} : memref<2x8x32xf32, #tpu.memory_space<vmem>>, vector<2x8x32xf32>,
    return
  }
  func.func @transform_0(%arg0: i32) -> (i32, i32, i32) {
    %c0_i32 = arith.constant 0 : i32
    %c0_i32_0 = arith.constant 0 : i32
    %c0_i32_1 = arith.constant 0 : i32
    return %arg0, %c0_i32, %c0_i32_0 : i32, i32, i32
  }
  func.func @transform_1(%arg0: i32) -> (i32, i32) {
    %c0_i32 = arith.constant 0 : i32
    %c0_i32_0 = arith.constant 0 : i32
    %c0_i32_1 = arith.constant 0 : i32
    return %c0_i32, %c0_i32_0 : i32, i32
  }
  func.func @transform_2(%arg0: i32) -> (i32, i32) {
    %c0_i32 = arith.constant 0 : i32
    %c0_i32_0 = arith.constant 0 : i32
    %c0_i32_1 = arith.constant 0 : i32
    return %c0_i32, %c0_i32_0 : i32, i32
  }
  func.func @transform_3(%arg0: i32) -> (i32, i32) {
    %c0_i32 = arith.constant 0 : i32
    %c0_i32_0 = arith.constant 0 : i32
    %c0_i32_1 = arith.constant 0 : i32
    return %c0_i32, %c0_i32_0 : i32, i32
  }
  func.func @transform_4(%arg0: i32) -> (i32, i32) {
    %c0_i32 = arith.constant 0 : i32
    %c0_i32_0 = arith.constant 0 : i32
    %c0_i32_1 = arith.constant 0 : i32
    return %c0_i32, %c0_i32_0 : i32, i32
  }
  func.func @transform_5(%arg0: i32) -> (i32, i32) {
    %c0_i32 = arith.constant 0 : i32
    %c0_i32_0 = arith.constant 0 : i32
    %c0_i32_1 = arith.constant 0 : i32
    return %c0_i32, %c0_i32_0 : i32, i32
  }
  func.func @transform_6(%arg0: i32) -> (i32, i32) {
    %c0_i32 = arith.constant 0 : i32
    %c0_i32_0 = arith.constant 0 : i32
    %c0_i32_1 = arith.constant 0 : i32
    return %c0_i32, %c0_i32_0 : i32, i32
  }
  func.func @transform_7(%arg0: i32) -> (i32, i32) {
    %c0_i32 = arith.constant 0 : i32
    %c0_i32_0 = arith.constant 0 : i32
    %c0_i32_1 = arith.constant 0 : i32
    return %c0_i32, %c0_i32_0 : i32, i32
  }
  func.func @transform_8(%arg0: i32) -> (i32, i32) {
    %c0_i32 = arith.constant 0 : i32
    %c0_i32_0 = arith.constant 0 : i32
    %c0_i32_1 = arith.constant 0 : i32
    return %c0_i32, %c0_i32_0 : i32, i32
  }
  func.func @transform_9(%arg0: i32) -> (i32, i32) {
    %c0_i32 = arith.constant 0 : i32
    %c0_i32_0 = arith.constant 0 : i32
    %c0_i32_1 = arith.constant 0 : i32
    return %c0_i32, %c0_i32_0 : i32, i32
  }
  func.func @transform_10(%arg0: i32) -> (i32, i32) {
    %c0_i32 = arith.constant 0 : i32
    %c0_i32_0 = arith.constant 0 : i32
    %c0_i32_1 = arith.constant 0 : i32
    return %c0_i32, %c0_i32_0 : i32, i32
  }
  func.func @transform_11(%arg0: i32) -> (i32, i32, i32) {
    %c0_i32 = arith.constant 0 : i32
    %c0_i32_0 = arith.constant 0 : i32
    %c0_i32_1 = arith.constant 0 : i32
    return %arg0, %c0_i32, %c0_i32_0 : i32, i32, i32
  }
}

</mosaic_0001>

<bundles_post_ra>
// kernel: tpu_custom_call.1
= control target key start
LH: loop header
LB: loop body
LE: loop exit
PB: predicated region body
PF: predicated region fallthrough
CT: control target
= control target key end

     0   :  { %16 = vsyncpa [#allocation7], 0  ;;  %s2227_s0 = inlined_call_operand.hbm [shape: f32[2,8,16], index: 0, kind: input, shape index: {}]   ;;  %s2228_s1 = inlined_call_operand.hbm [shape: bf16[16,96], index: 1, kind: input, shape index: {}]   ;;  %s2229_s2 = inlined_call_operand.vmem [shape: f32[1,96], index: 2, kind: input, shape index: {}]   ;;  %s2230_s3 = inlined_call_operand.vmem [shape: f32[1,32], index: 3, kind: input, shape index: {}]   ;;  %s2231_s4 = inlined_call_operand.hbm [shape: f32[1,32], index: 4, kind: input, shape index: {}]   ;;  %s2232_s5 = inlined_call_operand.vmem [shape: bf16[32,32], index: 5, kind: input, shape index: {}]   ;;  %s2233_s6 = inlined_call_operand.vmem [shape: f32[1,32], index: 6, kind: input, shape index: {}]   ;;  %s2234_s7 = inlined_call_operand.hbm [shape: bf16[32,32], index: 7, kind: input, shape index: {}]   ;;  %s2235_s8 = inlined_call_operand.vmem [shape: f32[1,32], index: 8, kind: input, shape index: {}]   ;;  %s2236_s9 = inlined_call_operand.vmem [shape: f32[1,32], index: 9, kind: input, shape index: {}]   ;;  %s2237_s10 = inlined_call_operand.vmem [shape: f32[1,32], index: 10, kind: input, shape index: {}]   ;;  %s2238_s11 = inlined_call_operand.hbm [shape: f32[2,8,32], index: 11, kind: output, shape index: {}]  }
   0x1   :  { %17 = vsyncpa [#allocation10], 0 }
   0x2   :  { %18 = vsyncpa [#allocation13], 0 }
   0x3   :  { %19 = vsyncpa [#allocation8], 0  ;;  %s1814_s17 = smov [#allocation9]   ;;  %s1696_s21 = scalar_lea.hbm %s2228_s1, 128 }
   0x4   :  { %s37_s18 = sshll.u32 %s1814_s17, 4  ;;  %p1697_p0 = scmp.ne.s32.totalorder %s2228_s1, %s1696_s21  ;;  %s38_s18 = int_to_ptr.vmem [resolvable:$true] %s37_s18 }
   0x5   :  { %p1700_p1 = scmp.lt.u32.totalorder %s1696_s21, %s2228_s1 }
   0x7   :  { %p1702_p2 = pnand %p1700_p1, %p1697_p0 }
   0x9   :  { %1705 = shalt.err (!%p1702_p2)
}
   0xa   :  { %s1706_s26 = scalar_lea.vmem %s38_s18, 128  ;;  %p1711_p4 = scmp.lt.s32.totalorder %s38_s18, %s38_s18 }
   0xb   :  { %p1707_p3 = scmp.ne.s32.totalorder %s38_s18, %s1706_s26  ;;  %p1712_p5 = scmp.lt.s32.totalorder %s1706_s26, %s1706_s26 }
   0xd   :  { %p1713_p6 = por %p1712_p5, %p1711_p4 }
   0xf   :  { %p1714_p7 = pnand %p1713_p6, %p1707_p3 }
  0x11   :  { %1717 = shalt.err (!%p1714_p7)
}
  0x12   :  { %s1815_s27 = smov 64   ;;  %s1816_s28 = smov 4  }
  0x13   :  { %43 = dma.hbm_to_vmem [thread:$0]  %s2228_s1, 128, %s38_s18, [#allocation10], %s1815_s27, %s1815_s27, %s1816_s28  }
  0x14   :  { %s1817_s12 = smov [#allocation6]   ;;  %s1718_s16 = scalar_lea.hbm %s2227_s0, 256 }
  0x15   :  { %s25_s13 = sshll.u32 %s1817_s12, 4  ;;  %p1719_p8 = scmp.ne.s32.totalorder %s2227_s0, %s1718_s16  ;;  %s26_s13 = int_to_ptr.vmem [resolvable:$true] %s25_s13 }
  0x16   :  { %p1722_p9 = scmp.lt.u32.totalorder %s1718_s16, %s2227_s0 }
  0x18   :  { %p1724_p10 = pnand %p1722_p9, %p1719_p8 }
  0x1a   :  { %1727 = shalt.err (!%p1724_p10)
}
  0x1b   :  { %s1728_s22 = scalar_lea.vmem %s26_s13, 256  ;;  %p1733_p12 = scmp.lt.s32.totalorder %s26_s13, %s26_s13 }
  0x1c   :  { %p1729_p11 = scmp.ne.s32.totalorder %s26_s13, %s1728_s22  ;;  %p1734_p13 = scmp.lt.s32.totalorder %s1728_s22, %s1728_s22 }
  0x1e   :  { %p1735_p0 = por %p1734_p13, %p1733_p12 }
  0x20   :  { %p1736_p1 = pnand %p1735_p0, %p1729_p11 }
  0x22   :  { %1739 = shalt.err (!%p1736_p1)
}
  0x23   :  { %s1818_s1 = smov 128   ;;  %s1819_s18 = smov 8  }
  0x24   :  { %31 = dma.hbm_to_vmem [thread:$0]  %s2227_s0, 256, %s26_s13, [#allocation7], %s1818_s1, %s1818_s1, %s1819_s18  }
  0x25   :  { %s1820_s25 = smov [#allocation11]   ;;  %s1821_s29 = smov [#allocation12]  }
  0x26   :  { %s54_s26 = sshll.u32 %s1820_s25, 4  ;;  %s67_s30 = sshll.u32 %s1821_s29, 4  ;;  %s55_s26 = int_to_ptr.vmem [resolvable:$true] %s54_s26  ;;  %s1927_s30 = int_to_ptr.vmem [resolvable:$true] %s67_s30 }
  0x27   :  { %s1740_s15 = scalar_lea.hbm %s2231_s4, 16 }
  0x28   :  { %p1741_p2 = scmp.ne.s32.totalorder %s2231_s4, %s1740_s15  ;;  %p1744_p3 = scmp.lt.u32.totalorder %s1740_s15, %s2231_s4 }
  0x2a   :  { %p1746_p4 = pnand %p1744_p3, %p1741_p2 }
  0x2c   :  { %1749 = shalt.err (!%p1746_p4)
}
  0x2d   :  { %s1750_s0 = scalar_lea.vmem %s55_s26, 16  ;;  %s1754_s13 = scalar_lea.vmem %s55_s26, 32 }
  0x2e   :  { %p1751_p5 = scmp.ne.s32.totalorder %s55_s26, %s1750_s0  ;;  %p1755_p6 = scmp.lt.s32.totalorder %s55_s26, %s55_s26 }
  0x2f   :  { %p1756_p7 = scmp.lt.s32.totalorder %s1754_s13, %s1750_s0 }
  0x31   :  { %p1757_p8 = por %p1756_p7, %p1755_p6 }
  0x33   :  { %p1758_p9 = pnand %p1757_p8, %p1751_p5 }
  0x35   :  { %1761 = shalt.err (!%p1758_p9)
}
  0x36   :  { %57 = dma.hbm_to_vmem [thread:$0]  %s2231_s4, 16, %s55_s26, [#allocation10]  }
  0x37   :  { %s1762_s25 = scalar_lea.hbm %s2234_s7, 256 }
  0x38   :  { %p1763_p10 = scmp.ne.s32.totalorder %s2234_s7, %s1762_s25  ;;  %p1766_p11 = scmp.lt.u32.totalorder %s1762_s25, %s2234_s7 }
  0x3a   :  { %p1768_p12 = pnand %p1766_p11, %p1763_p10 }
  0x3c   :  { %1771 = shalt.err (!%p1768_p12)
}
  0x3d   :  { %s1772_s16 = scalar_lea.vmem %s1927_s30, 256  ;;  %p1777_p0 = scmp.lt.s32.totalorder %s1927_s30, %s1927_s30 }
  0x3e   :  { %p1773_p13 = scmp.ne.s32.totalorder %s1927_s30, %s1772_s16  ;;  %p1778_p1 = scmp.lt.s32.totalorder %s1772_s16, %s1772_s16 }
  0x40   :  { %p1779_p2 = por %p1778_p1, %p1777_p0 }
  0x42   :  { %p1780_p3 = pnand %p1779_p2, %p1773_p13 }
  0x44   :  { %1783 = shalt.err (!%p1780_p3)
}
  0x45   :  { %73 = dma.hbm_to_vmem [thread:$0]  %s2234_s7, 256, %s1927_s30, [#allocation13], %s1815_s27, %s1815_s27, %s1816_s28  }
  0x46   :  { %1806 = dma.done.wait [#allocation7], 256  }
  0x47   :  { %1807 = vsyncadd [#allocation7], 4294967040 }
  0x48   :  { %1808 = dma.done.wait [#allocation10], 144  }
  0x49   :  { %1809 = vsyncadd [#allocation10], 4294967152 }
  0x4a   :  { %1810 = dma.done.wait [#allocation13], 256  }
  0x4b   :  { %1811 = vsyncadd [#allocation13], 4294967040  ;;  %v1822_v0 = vmov 0.0   ;;  %vm1823_vm0 = vmmov 0   ;;  %v1651_v1 = vld [vmem:[#allocation9] sm:$0xff]   ;;  %v93_v2 = vld [vmem:[#allocation6] sm:$0xff] }
  0x4c   :  { %1510 = vmatprep.subr.bf16.mxu0 %v1822_v0  ;;  %1512 = vmatprep.mubr.msk.bf16.mxu0 %vm1823_vm0, %v1822_v0  ;;  %v94_v3 = vld [vmem:[#allocation6 + $0x8] sm:$0xff]  ;;  %vm111_vm1 = vcmask 130048   ;;  %v1431_v5 = vld [vmem:[%s2229_s2] ss:$0 sm:$0xff]  ;;  %s1824_s30 = smov 80   ;;  %s1825_s2 = smov 96  }
  0x4d   :  { %1516 = vmatprep.subr.bf16.mxu1 %v1822_v0  ;;  %1518 = vmatprep.mubr.msk.bf16.mxu1 %vm1823_vm0, %v1822_v0  ;;  %v95_v4 = vpack.c.bf16 %v94_v3, %v93_v2  ;;  %vm160_vm2 = vcmask 60416   ;;  %s1826_s17 = smov 88   ;;  %s1827_s19 = smov 120   ;;  %vm307_vm3 = vcmask 64512   ;;  %vm775_vm4 = vcmask 1043456  }
  0x4e   :  { %1511 = vmatpush3.bf16.msra.mxu0 %v1651_v1  ;;  %s1828_s20 = smov 72   ;;  %s1829_s0 = smov 112   ;;  %vm1146_vm5 = vcmask 130112   ;;  %vm1152_vm6 = vcmask 195712   ;;  %vm1158_vm7 = vcmask 261312   ;;  %vm1182_vm8 = vcmask 261120  }
  0x4f   :  { %1522 = vmatprep.subr.bf16.mxu0 %v1822_v0  ;;  %s1830_s13 = smov 104   ;;  %s1831_s21 = smov 56  }
  0x50   :  { %s1832_s22 = smov 40   ;;  %s1833_s23 = smov 48  }
  0x51   :  { %1513 = vmatmul.mubr.msk.bf16.vlgmr.msra.gmra.mrb[0].mxu0 %vm111_vm1, %v95_v4  ;;  %s1835_s24 = smov 24  }
  0x52   :  { %1524 = vmatprep.mubr.msk.bf16.mxu0 %vm1823_vm0, %v1822_v0 }
 0x124   :  { %v149_v6 = vpop.f32.mrb[0].mxu0 }
 0x125   :  { %v1973_v7 = vadd.f32 %v1431_v5, %v149_v6  ;;  %v1514_v8 = vpop.f32.mrb[1].mxu0 }
 0x126   :  { %v152_v9 = vpop.f32.mrb[2].mxu0 }
 0x127   :  { %v156_v10 = vmul.f32 0.35355338, %v1973_v7  ;;  %v1978_v11 = vpack.c.bf16 %v1973_v7, %v1973_v7  ;;  %v1980_v12 = vadd.f32 %v1431_v5, %v152_v9  ;;  %v1515_v13 = vpop.f32.mrb[3].mxu0 }
 0x129   :  { %v157_v14 = vmul.f32 0.35355338, %v1980_v12  ;;  %196 = vrot.lane.b32.xlu1 %v1978_v11, %s1824_s30  ;;  %165 = vrot.lane.b32.xlu0 %v1978_v11, %s1825_s2  ;;  %v1467_v17 = vpack.c.bf16 %v156_v10, %v156_v10  ;;  %v1991_v18 = vpack.c.bf16 %v1980_v12, %v1980_v12 }
 0x12b   :  { %v158_v15 = vpack.c.bf16 %v157_v14, %v156_v10  ;;  %v1468_v16 = vpack.c.bf16 %v157_v14, %v157_v14 }
 0x12d   :  { %161 = vst.msk [vmem:[#allocation2] sm:$0xf] %vm160_vm2, %v158_v15  ;;  %225 = vst.msk [vmem:[#allocation2 + $0x10] sm:$0xf] %vm160_vm2, %v1468_v16  ;;  %181 = vrot.lane.b32.xlu0 %v1978_v11, %s1826_s17  ;;  %176 = vrot.lane.b32.xlu1 %v1467_v17, %s1827_s19 }
 0x131   :  { %211 = vrot.lane.b32.xlu0 %v1978_v11, %s1828_s20  ;;  %191 = vrot.lane.b32.xlu1 %v1467_v17, %s1829_s0 }
 0x134   :  { %v283_v34 = vld [vmem:[#allocation2] sm:$0xf]  ;;  %v287_v51 = vld [vmem:[#allocation2 + $0x10] sm:$0xf] }
 0x135   :  { %206 = vrot.lane.b32.xlu1 %v1467_v17, %s1830_s13  ;;  %228 = vrot.lane.b32.xlu0 %v1991_v18, %s1825_s2 }
 0x139   :  { %258 = vrot.lane.b32.xlu1 %v1991_v18, %s1824_s30  ;;  %243 = vrot.lane.b32.xlu0 %v1991_v18, %s1826_s17  ;;  %s1836_s30 = smov [#allocation14]  }
 0x13a   :  { %s1417_s2 = sshll.u32 %s1836_s30, 4  ;;  %s1418_s2 = int_to_ptr.vmem [resolvable:$true] %s1417_s2 }
 0x13b   :  { %s1784_s17 = scalar_lea.vmem %s1418_s2, 256  ;;  %p1789_p5 = scmp.lt.s32.totalorder %s1418_s2, %s1418_s2 }
 0x13c   :  { %p1785_p4 = scmp.ne.s32.totalorder %s1418_s2, %s1784_s17  ;;  %p1790_p6 = scmp.lt.s32.totalorder %s1784_s17, %s1784_s17 }
 0x13d   :  { %273 = vrot.lane.b32.xlu1 %v1991_v18, %s1828_s20  ;;  %238 = vrot.lane.b32.xlu0 %v1468_v16, %s1827_s19 }
 0x13e   :  { %p1791_p7 = por %p1790_p6, %p1789_p5 }
 0x140   :  { %p1792_p8 = pnand %p1791_p7, %p1785_p4 }
 0x141   :  { %268 = vrot.lane.b32.xlu1 %v1468_v16, %s1830_s13  ;;  %253 = vrot.lane.b32.xlu0 %v1468_v16, %s1829_s0 }
 0x145   :  { %169 = vrot.lane.b32.xlu0 %v1978_v11, %s1815_s27 }
 0x19b   :  { %v197_v19 = vpop.permute.xlu1 %196  ;;  %v166_v20 = vpop.permute.xlu0 %165 }
 0x19c   :  { %200 = vst.msk [vmem:[#allocation3 + $0x8] sm:$0xf] %vm160_vm2, %v197_v19  ;;  %168 = vst.msk [vmem:[#allocation3] sm:$0xf] %vm160_vm2, %v166_v20 }
 0x19f   :  { %v182_v21 = vpop.permute.xlu0 %181  ;;  %v177_v22 = vpop.permute.xlu1 %176 }
 0x1a0   :  { %185 = vst.msk [vmem:[#allocation3 + $0x4] sm:$0xf] %vm160_vm2, %v182_v21  ;;  %180 = vst.msk [vmem:[#allocation2 + $0x4] sm:$0xf] %vm160_vm2, %v177_v22 }
 0x1a3   :  { %v212_v23 = vpop.permute.xlu0 %211  ;;  %v192_v24 = vpop.permute.xlu1 %191  ;;  %v291_v25 = vld [vmem:[#allocation3] sm:$0xf]  ;;  %v293_v31 = vld [vmem:[#allocation3 + $0x8] sm:$0xf] }
 0x1a4   :  { %215 = vst.msk [vmem:[#allocation3 + $0xc] sm:$0xf] %vm160_vm2, %v212_v23  ;;  %195 = vst.msk [vmem:[#allocation2 + $0x8] sm:$0xf] %vm160_vm2, %v192_v24  ;;  %v312_v26 = vsel %vm307_vm3, %v291_v25, 0  ;;  %v404_v35 = vsel %vm307_vm3, %v293_v31, 0 }
 0x1a5   :  { %1517 = vmatpush3.bf16.xpose.msra.mxu1 %v312_v26 }
 0x1a6   :  { %1528 = vmatprep.subr.bf16.mxu1 %v1822_v0 }
 0x1a7   :  { %v207_v27 = vpop.permute.xlu1 %206  ;;  %v229_v28 = vpop.permute.xlu0 %228  ;;  %v292_v29 = vld [vmem:[#allocation3 + $0x4] sm:$0xf] }
 0x1a8   :  { %210 = vst.msk [vmem:[#allocation2 + $0xc] sm:$0xf] %vm160_vm2, %v207_v27  ;;  %232 = vst.msk [vmem:[#allocation3 + $0x10] sm:$0xf] %vm160_vm2, %v229_v28  ;;  %v358_v30 = vsel %vm307_vm3, %v292_v29, 0 }
 0x1a9   :  { %1523 = vmatpush3.bf16.xpose.msra.mxu0 %v358_v30  ;;  %v284_v39 = vld [vmem:[#allocation2 + $0x4] sm:$0xf] }
 0x1aa   :  { %1534 = vmatprep.subr.bf16.mxu0 %v1822_v0 }
 0x1ab   :  { %v259_v32 = vpop.permute.xlu1 %258  ;;  %v244_v33 = vpop.permute.xlu0 %243  ;;  %v294_v36 = vld [vmem:[#allocation3 + $0xc] sm:$0xf]  ;;  %v285_v44 = vld [vmem:[#allocation2 + $0x8] sm:$0xf] }
 0x1ac   :  { %262 = vst.msk [vmem:[#allocation3 + $0x18] sm:$0xf] %vm160_vm2, %v259_v32  ;;  %247 = vst.msk [vmem:[#allocation3 + $0x14] sm:$0xf] %vm160_vm2, %v244_v33  ;;  %1519 = vmatmul.mubr.msk.bf16.vlgmr.msra.gmra.mrb[0].mxu1 %vm307_vm3, %v283_v34  ;;  %v450_v40 = vsel %vm307_vm3, %v294_v36, 0 }
 0x1ad   :  { %1529 = vmatpush3.bf16.xpose.msra.mxu1 %v404_v35  ;;  %1530 = vmatprep.mubr.msk.bf16.mxu1 %vm1823_vm0, %v1822_v0 }
 0x1ae   :  { %1540 = vmatprep.subr.bf16.mxu1 %v1822_v0 }
 0x1af   :  { %v274_v37 = vpop.permute.xlu1 %273  ;;  %v239_v38 = vpop.permute.xlu0 %238  ;;  %v295_v41 = vld [vmem:[#allocation3 + $0x10] sm:$0xf]  ;;  %v286_v48 = vld [vmem:[#allocation2 + $0xc] sm:$0xf] }
 0x1b0   :  { %277 = vst.msk [vmem:[#allocation3 + $0x1c] sm:$0xf] %vm160_vm2, %v274_v37  ;;  %242 = vst.msk [vmem:[#allocation2 + $0x14] sm:$0xf] %vm160_vm2, %v239_v38  ;;  %1525 = vmatmul.mubr.msk.bf16.vlgmr.msra.gmra.mrb[4].mxu0 %vm307_vm3, %v284_v39  ;;  %v496_v45 = vsel %vm307_vm3, %v295_v41, 0 }
 0x1b1   :  { %1535 = vmatpush3.bf16.xpose.msra.mxu0 %v450_v40  ;;  %1536 = vmatprep.mubr.msk.bf16.mxu0 %vm1823_vm0, %v1822_v0 }
 0x1b2   :  { %1546 = vmatprep.subr.bf16.mxu0 %v1822_v0 }
 0x1b3   :  { %v269_v42 = vpop.permute.xlu1 %268  ;;  %v254_v43 = vpop.permute.xlu0 %253  ;;  %v296_v46 = vld [vmem:[#allocation3 + $0x14] sm:$0xf]  ;;  %v297_v50 = vld [vmem:[#allocation3 + $0x18] sm:$0xf] }
 0x1b4   :  { %272 = vst.msk [vmem:[#allocation2 + $0x1c] sm:$0xf] %vm160_vm2, %v269_v42  ;;  %257 = vst.msk [vmem:[#allocation2 + $0x18] sm:$0xf] %vm160_vm2, %v254_v43  ;;  %1531 = vmatmul.mubr.msk.bf16.vlgmr.msra.gmra.mrb[4].mxu1 %vm307_vm3, %v285_v44  ;;  %v542_v49 = vsel %vm307_vm3, %v296_v46, 0  ;;  %v588_v52 = vsel %vm307_vm3, %v297_v50, 0 }
 0x1b5   :  { %1541 = vmatpush3.bf16.xpose.msra.mxu1 %v496_v45  ;;  %1542 = vmatprep.mubr.msk.bf16.mxu1 %vm1823_vm0, %v1822_v0 }
 0x1b6   :  { %1552 = vmatprep.subr.bf16.mxu1 %v1822_v0 }
 0x1b7   :  { %v170_v47 = vpop.permute.xlu0 %169  ;;  %v298_v53 = vld [vmem:[#allocation3 + $0x1c] sm:$0xf]  ;;  %v288_v54 = vld [vmem:[#allocation2 + $0x14] sm:$0xf] }
 0x1b8   :  { %172 = vst.msk [vmem:[#allocation4] sm:$0xf] %vm160_vm2, %v170_v47  ;;  %1537 = vmatmul.mubr.msk.bf16.vlgmr.msra.gmra.mrb[8].mxu0 %vm307_vm3, %v286_v48  ;;  %v634_v55 = vsel %vm307_vm3, %v298_v53, 0 }
 0x1b9   :  { %1547 = vmatpush3.bf16.xpose.msra.mxu0 %v542_v49  ;;  %1548 = vmatprep.mubr.msk.bf16.mxu0 %vm1823_vm0, %v1822_v0 }
 0x1ba   :  { %1558 = vmatprep.subr.bf16.mxu0 %v1822_v0 }
 0x1bb   :  { %v289_v57 = vld [vmem:[#allocation2 + $0x18] sm:$0xf]  ;;  %v290_v59 = vld [vmem:[#allocation2 + $0x1c] sm:$0xf] }
 0x1bc   :  { %1543 = vmatmul.mubr.msk.bf16.vlgmr.msra.gmra.mrb[8].mxu1 %vm307_vm3, %v287_v51 }
 0x1bd   :  { %1553 = vmatpush3.bf16.xpose.msra.mxu1 %v588_v52  ;;  %1554 = vmatprep.mubr.msk.bf16.mxu1 %vm1823_vm0, %v1822_v0 }
 0x1be   :  { %1564 = vmatprep.subr.bf16.mxu1 %v1822_v0 }
 0x1bf   :  { %v299_v56 = vld [vmem:[#allocation4] sm:$0xf] }
 0x1c0   :  { %1549 = vmatmul.mubr.msk.bf16.vlgmr.msra.gmra.mrb[12].mxu0 %vm307_vm3, %v288_v54  ;;  %v777_v58 = vsel %vm775_vm4, %v299_v56, 0 }
 0x1c1   :  { %1559 = vmatpush3.bf16.xpose.msra.mxu0 %v634_v55  ;;  %1560 = vmatprep.mubr.msk.bf16.mxu0 %vm1823_vm0, %v1822_v0 }
 0x1c2   :  { %1570 = vmatprep.subr.bf16.mxu0 %v1822_v0 }
 0x1c4   :  { %1555 = vmatmul.mubr.msk.bf16.vlgmr.msra.gmra.mrb[12].mxu1 %vm307_vm3, %v289_v57 }
 0x1c5   :  { %1565 = vmatpush3.bf16.msra.mxu1 %v777_v58  ;;  %1566 = vmatprep.mubr.msk.bf16.mxu1 %vm1823_vm0, %v1822_v0 }
 0x1c6   :  { %1576 = vmatprep.subr.bf16.mxu1 %v1822_v0 }
 0x1c8   :  { %1561 = vmatmul.mubr.msk.bf16.vlgmr.msra.gmra.mrb[16].mxu0 %vm307_vm3, %v290_v59 }
 0x1c9   :  { %1572 = vmatprep.mubr.msk.bf16.mxu0 %vm1823_vm0, %v1822_v0 }
 0x27f   :  { %v348_v60 = vpop.f32.mrb[0].mxu1 }
 0x280   :  { %v1520_v61 = vpop.f32.mrb[1].mxu1  ;;  %v676_v62 = vsel %vm307_vm3, %v348_v60, -inf }
 0x281   :  { %677 = vmax.xlane.f32.xlu0 %v676_v62  ;;  %v351_v63 = vpop.f32.mrb[2].mxu1 }
 0x282   :  { %v1521_v1 = vpop.f32.mrb[3].mxu1 }
 0x283   :  { %v394_v2 = vpop.f32.mrb[4].mxu0 }
 0x284   :  { %v1526_v3 = vpop.f32.mrb[5].mxu0  ;;  %v679_v4 = vsel %vm307_vm3, %v394_v2, -inf }
 0x285   :  { %680 = vmax.xlane.f32.xlu1 %v679_v4  ;;  %v397_v5 = vpop.f32.mrb[6].mxu0 }
 0x286   :  { %v1527_v6 = vpop.f32.mrb[7].mxu0 }
 0x287   :  { %v440_v8 = vpop.f32.mrb[4].mxu1 }
 0x288   :  { %v1532_v9 = vpop.f32.mrb[5].mxu1  ;;  %v682_v10 = vsel %vm307_vm3, %v440_v8, -inf }
 0x289   :  { %683 = vmax.xlane.f32.xlu0 %v682_v10  ;;  %v443_v13 = vpop.f32.mrb[6].mxu1 }
 0x28a   :  { %v1533_v14 = vpop.f32.mrb[7].mxu1 }
 0x28b   :  { %v2059_v15 = vpop.f32.mrb[8].mxu0 }
 0x28c   :  { %v1538_v16 = vpop.f32.mrb[9].mxu0  ;;  %v685_v17 = vsel %vm307_vm3, %v2059_v15, -inf }
 0x28d   :  { %686 = vmax.xlane.f32.xlu0 %v685_v17  ;;  %v489_v19 = vpop.f32.mrb[10].mxu0 }
 0x28e   :  { %v1539_v20 = vpop.f32.mrb[11].mxu0 }
 0x28f   :  { %v532_v21 = vpop.f32.mrb[8].mxu1 }
 0x290   :  { %v1544_v22 = vpop.f32.mrb[9].mxu1  ;;  %v688_v23 = vsel %vm307_vm3, %v532_v21, -inf }
 0x291   :  { %v535_v24 = vpop.f32.mrb[10].mxu1  ;;  %689 = vmax.xlane.f32.xlu1 %v688_v23 }
 0x292   :  { %v1545_v25 = vpop.f32.mrb[11].mxu1 }
 0x293   :  { %v578_v26 = vpop.f32.mrb[12].mxu0 }
 0x294   :  { %v1550_v27 = vpop.f32.mrb[13].mxu0  ;;  %v691_v28 = vsel %vm307_vm3, %v578_v26, -inf }
 0x295   :  { %692 = vmax.xlane.f32.xlu0 %v691_v28  ;;  %v581_v29 = vpop.f32.mrb[14].mxu0 }
 0x296   :  { %v1551_v30 = vpop.f32.mrb[15].mxu0 }
 0x297   :  { %v2065_v31 = vpop.f32.mrb[12].mxu1 }
 0x298   :  { %v1556_v32 = vpop.f32.mrb[13].mxu1  ;;  %v694_v40 = vsel %vm307_vm3, %v2065_v31, -inf }
 0x299   :  { %v627_v33 = vpop.f32.mrb[14].mxu1 }
 0x29a   :  { %v1557_v34 = vpop.f32.mrb[15].mxu1 }
 0x29b   :  { %v670_v35 = vpop.f32.mrb[16].mxu0 }
 0x29c   :  { %v1562_v36 = vpop.f32.mrb[17].mxu0  ;;  %v697_v37 = vsel %vm307_vm3, %v670_v35, -inf }
 0x29d   :  { %698 = vmax.xlane.f32.xlu0 %v697_v37  ;;  %v673_v38 = vpop.f32.mrb[18].mxu0 }
 0x29e   :  { %v1563_v39 = vpop.f32.mrb[19].mxu0 }
 0x2a2   :  { %186 = vrot.lane.b32.xlu1 %v1978_v11, %s1831_s21 }
 0x2b3   :  { %216 = vrot.lane.b32.xlu0 %v1978_v11, %s1832_s22 }
 0x2c6   :  { %695 = vmax.xlane.f32.xlu1 %v694_v40 }
 0x2d7   :  { %201 = vrot.lane.b32.xlu1 %v1978_v11, %s1833_s23 }
 0x2db   :  { %233 = vrot.lane.b32.xlu1 %v1991_v18, %s1815_s27  ;;  %s1834_s27 = smov 16  }
 0x30e   :  { %v678_v41 = vpop.xlane.xlu0 %677 }
 0x30f   :  { %v700_v42 = vsub.f32 %v348_v60, %v678_v41 }
 0x311   :  { %v708_v43 = vmul.f32 1.442695, %v700_v42 }
 0x312   :  { %v681_v44 = vpop.xlane.xlu1 %680 }
 0x313   :  { %1656 = vpow2.f32 %v708_v43  ;;  %v701_v45 = vsub.f32 %v394_v2, %v681_v44 }
 0x315   :  { %v710_v46 = vmul.f32 1.442695, %v701_v45 }
 0x316   :  { %v684_v47 = vpop.xlane.xlu0 %683 }
 0x317   :  { %1658 = vpow2.f32 %v710_v46  ;;  %v702_v48 = vsub.f32 %v440_v8, %v684_v47 }
 0x319   :  { %v712_v49 = vmul.f32 1.442695, %v702_v48 }
 0x31a   :  { %v687_v51 = vpop.xlane.xlu0 %686 }
 0x31b   :  { %1660 = vpow2.f32 %v712_v49  ;;  %v703_v16 = vsub.f32 %v2059_v15, %v687_v51 }
 0x31d   :  { %v2078_v50 = vpop.eup %1656  ;;  %v714_v17 = vmul.f32 1.442695, %v703_v16 }
 0x31e   :  { %v690_v52 = vpop.xlane.xlu1 %689  ;;  %v724_v11 = vsel %vm307_vm3, %v2078_v50, 0.0 }
 0x31f   :  { %v704_v53 = vsub.f32 %v532_v21, %v690_v52  ;;  %725 = vadd.xlane.f32.xlu1 %v724_v11 }
 0x321   :  { %v2082_v54 = vpop.eup %1658  ;;  %v716_v55 = vmul.f32 1.442695, %v704_v53 }
 0x322   :  { %v187_v56 = vpop.permute.xlu1 %186  ;;  %v693_v57 = vpop.xlane.xlu0 %692  ;;  %v727_v58 = vsel %vm307_vm3, %v2082_v54, 0.0 }
 0x323   :  { %1662 = vpow2.f32 %v716_v55  ;;  %190 = vst.msk [vmem:[#allocation4 + $0x4] sm:$0xf] %vm160_vm2, %v187_v56  ;;  %v705_v59 = vsub.f32 %v578_v26, %v693_v57  ;;  %728 = vadd.xlane.f32.xlu0 %v727_v58 }
 0x325   :  { %v2087_v60 = vpop.eup %1660  ;;  %v718_v61 = vmul.f32 1.442695, %v705_v59 }
 0x326   :  { %v730_v62 = vsel %vm307_vm3, %v2087_v60, 0.0 }
 0x327   :  { %1664 = vpow2.f32 %v718_v61  ;;  %731 = vadd.xlane.f32.xlu1 %v730_v62 }
 0x32a   :  { %v699_v63 = vpop.xlane.xlu0 %698  ;;  %v300_v1 = vld [vmem:[#allocation4 + $0x4] sm:$0xf] }
 0x32b   :  { %v707_v2 = vsub.f32 %v670_v35, %v699_v63  ;;  %v823_v3 = vsel %vm775_vm4, %v300_v1, 0 }
 0x32c   :  { %1571 = vmatpush3.bf16.msra.mxu0 %v823_v3 }
 0x32d   :  { %v2092_v4 = vpop.eup %1662  ;;  %v722_v5 = vmul.f32 1.442695, %v707_v2  ;;  %1582 = vmatprep.subr.bf16.mxu0 %v1822_v0 }
 0x32e   :  { %v217_v6 = vpop.permute.xlu0 %216  ;;  %v736_v8 = vsel %vm307_vm3, %v2092_v4, 0.0 }
 0x32f   :  { %1666 = vpow2.f32 %v722_v5  ;;  %220 = vst.msk [vmem:[#allocation4 + $0xc] sm:$0xf] %vm160_vm2, %v217_v6  ;;  %737 = vadd.xlane.f32.xlu1 %v736_v8 }
 0x330   :  { %1668 = vpow2.f32 %v714_v17 }
 0x331   :  { %v2098_v9 = vpop.eup %1664 }
 0x332   :  { %v739_v10 = vsel %vm307_vm3, %v2098_v9, 0.0 }
 0x333   :  { %740 = vadd.xlane.f32.xlu1 %v739_v10 }
 0x336   :  { %v302_v38 = vld [vmem:[#allocation4 + $0xc] sm:$0xf] }
 0x337   :  { %v915_v42 = vsel %vm775_vm4, %v302_v38, 0 }
 0x339   :  { %v2102_v13 = vpop.eup %1666  ;;  %248 = vrot.lane.b32.xlu0 %v1991_v18, %s1831_s21 }
 0x33a   :  { %v745_v14 = vsel %vm307_vm3, %v2102_v13, 0.0  ;;  %v2111_v20 = vpop.eup %1668 }
 0x33b   :  { %746 = vadd.xlane.f32.xlu1 %v745_v14  ;;  %v733_v24 = vsel %vm307_vm3, %v2111_v20, 0.0 }
 0x34c   :  { %278 = vrot.lane.b32.xlu1 %v1991_v18, %s1832_s22 }
 0x353   :  { %v696_v19 = vpop.xlane.xlu1 %695 }
 0x354   :  { %v706_v21 = vsub.f32 %v2065_v31, %v696_v19 }
 0x356   :  { %v720_v22 = vmul.f32 1.442695, %v706_v21 }
 0x357   :  { %v202_v23 = vpop.permute.xlu1 %201 }
 0x358   :  { %1670 = vpow2.f32 %v720_v22  ;;  %205 = vst.msk [vmem:[#allocation4 + $0x8] sm:$0xf] %vm160_vm2, %v202_v23  ;;  %734 = vadd.xlane.f32.xlu0 %v733_v24 }
 0x35b   :  { %v234_v15 = vpop.permute.xlu1 %233 }
 0x35c   :  { %237 = vst.msk [vmem:[#allocation4 + $0x10] sm:$0xf] %vm160_vm2, %v234_v15 }
 0x35f   :  { %v301_v33 = vld [vmem:[#allocation4 + $0x8] sm:$0xf] }
 0x362   :  { %v2118_v25 = vpop.eup %1670 }
 0x363   :  { %v742_v26 = vsel %vm307_vm3, %v2118_v25, 0.0  ;;  %v303_v43 = vld [vmem:[#allocation4 + $0x10] sm:$0xf] }
 0x364   :  { %743 = vadd.xlane.f32.xlu0 %v742_v26  ;;  %v961_v46 = vsel %vm775_vm4, %v303_v43, 0 }
 0x37a   :  { %263 = vrot.lane.b32.xlu0 %v1991_v18, %s1833_s23  ;;  %v869_v18 = vsel %vm775_vm4, %v301_v33, 0 }
 0x3ac   :  { %v726_v27 = vpop.xlane.xlu1 %725 }
 0x3ad   :  { %1672 = vrcp.f32 %v726_v27 }
 0x3b0   :  { %v729_v28 = vpop.xlane.xlu0 %728 }
 0x3b1   :  { %1674 = vrcp.f32 %v729_v28 }
 0x3b4   :  { %v732_v29 = vpop.xlane.xlu1 %731  ;;  %v249_v30 = vpop.permute.xlu0 %248 }
 0x3b5   :  { %1676 = vrcp.f32 %v732_v29  ;;  %252 = vst.msk [vmem:[#allocation4 + $0x14] sm:$0xf] %vm160_vm2, %v249_v30 }
 0x3b7   :  { %v1673_v31 = vpop.eup %1672 }
 0x3b8   :  { %v756_v32 = vmul.f32 %v1673_v31, %v2078_v50 }
 0x3ba   :  { %v764_v34 = vpack.c.bf16 %v756_v32, %v756_v32 }
 0x3bb   :  { %v1675_v35 = vpop.eup %1674 }
 0x3bc   :  { %v757_v36 = vmul.f32 %v1675_v35, %v2082_v54  ;;  %1567 = vmatmul.mubr.msk.bf16.vlgmr.msra.gmra.mrb[16].mxu1 %vm307_vm3, %v764_v34  ;;  %v738_v37 = vpop.xlane.xlu1 %737  ;;  %v304_v55 = vld [vmem:[#allocation4 + $0x14] sm:$0xf] }
 0x3bd   :  { %1577 = vmatpush3.bf16.msra.mxu1 %v869_v18  ;;  %1678 = vrcp.f32 %v738_v37  ;;  %1578 = vmatprep.mubr.msk.bf16.mxu1 %vm1823_vm0, %v1822_v0  ;;  %v1007_v58 = vsel %vm775_vm4, %v304_v55, 0 }
 0x3be   :  { %v765_v39 = vpack.c.bf16 %v757_v36, %v757_v36  ;;  %1588 = vmatprep.subr.bf16.mxu1 %v1822_v0 }
 0x3bf   :  { %v1677_v40 = vpop.eup %1676 }
 0x3c0   :  { %v758_v41 = vmul.f32 %v1677_v40, %v2087_v60  ;;  %1573 = vmatmul.mubr.msk.bf16.vlgmr.msra.gmra.mrb[20].mxu0 %vm307_vm3, %v765_v39  ;;  %v741_v45 = vpop.xlane.xlu1 %740 }
 0x3c1   :  { %1583 = vmatpush3.bf16.msra.mxu0 %v915_v42  ;;  %1584 = vmatprep.mubr.msk.bf16.mxu0 %vm1823_vm0, %v1822_v0 }
 0x3c2   :  { %v766_v44 = vpack.c.bf16 %v758_v41, %v758_v41  ;;  %1594 = vmatprep.subr.bf16.mxu0 %v1822_v0 }
 0x3c4   :  { %1579 = vmatmul.mubr.msk.bf16.vlgmr.msra.gmra.mrb[20].mxu1 %vm307_vm3, %v766_v44 }
 0x3c5   :  { %1589 = vmatpush3.bf16.msra.mxu1 %v961_v46  ;;  %1590 = vmatprep.mubr.msk.bf16.mxu1 %vm1823_vm0, %v1822_v0 }
 0x3c6   :  { %1600 = vmatprep.subr.bf16.mxu1 %v1822_v0 }
 0x3c7   :  { %v1679_v47 = vpop.eup %1678 }
 0x3c8   :  { %v760_v48 = vmul.f32 %v1679_v47, %v2092_v4  ;;  %v747_v49 = vpop.xlane.xlu1 %746 }
 0x3ca   :  { %v768_v50 = vpack.c.bf16 %v760_v48, %v760_v48 }
 0x3cc   :  { %1591 = vmatmul.mubr.msk.bf16.vlgmr.msra.gmra.mrb[24].mxu1 %vm307_vm3, %v768_v50  ;;  %v279_v51 = vpop.permute.xlu1 %278 }
 0x3cd   :  { %282 = vst.msk [vmem:[#allocation4 + $0x1c] sm:$0xf] %vm160_vm2, %v279_v51  ;;  %1602 = vmatprep.mubr.msk.bf16.mxu1 %vm1823_vm0, %v1822_v0 }
 0x3d4   :  { %v306_v61 = vld [vmem:[#allocation4 + $0x1c] sm:$0xf] }
 0x3d5   :  { %v1099_v3 = vsel %vm775_vm4, %v306_v61, 0 }
 0x3e5   :  { %v735_v52 = vpop.xlane.xlu0 %734 }
 0x3e6   :  { %1680 = vrcp.f32 %v735_v52 }
 0x3e7   :  { %1682 = vrcp.f32 %v741_v45 }
 0x3e8   :  { %1684 = vrcp.f32 %v747_v49 }
 0x3f0   :  { %v1681_v11 = vpop.eup %1680 }
 0x3f1   :  { %v759_v53 = vmul.f32 %v1681_v11, %v2111_v20  ;;  %v744_v54 = vpop.xlane.xlu0 %743  ;;  %v1683_v57 = vpop.eup %1682 }
 0x3f2   :  { %1686 = vrcp.f32 %v744_v54  ;;  %v761_v60 = vmul.f32 %v1683_v57, %v2098_v9  ;;  %v1685_v62 = vpop.eup %1684 }
 0x3f3   :  { %v767_v56 = vpack.c.bf16 %v759_v53, %v759_v53  ;;  %v763_v6 = vmul.f32 %v1685_v62, %v2102_v13 }
 0x3f4   :  { %v769_v63 = vpack.c.bf16 %v761_v60, %v761_v60 }
 0x3f5   :  { %1585 = vmatmul.mubr.msk.bf16.vlgmr.msra.gmra.mrb[24].mxu0 %vm307_vm3, %v767_v56  ;;  %v264_v59 = vpop.permute.xlu0 %263  ;;  %v771_v9 = vpack.c.bf16 %v763_v6, %v763_v6 }
 0x3f6   :  { %1595 = vmatpush3.bf16.msra.mxu0 %v1007_v58  ;;  %267 = vst.msk [vmem:[#allocation4 + $0x18] sm:$0xf] %vm160_vm2, %v264_v59  ;;  %1596 = vmatprep.mubr.msk.bf16.mxu0 %vm1823_vm0, %v1822_v0 }
 0x3f7   :  { %1606 = vmatprep.subr.bf16.mxu0 %v1822_v0 }
 0x3fc   :  { %v1687_v1 = vpop.eup %1686 }
 0x3fd   :  { %v762_v2 = vmul.f32 %v1687_v1, %v2118_v25  ;;  %1597 = vmatmul.mubr.msk.bf16.vlgmr.msra.gmra.mrb[28].mxu0 %vm307_vm3, %v769_v63  ;;  %v305_v4 = vld [vmem:[#allocation4 + $0x18] sm:$0xf]  ;;  %v1653_v1 = vld [vmem:[%s2232_s5 + $0x8] sm:$0xff]  }
 0x3fe   :  { %1607 = vmatpush3.bf16.msra.mxu0 %v1099_v3  ;;  %v1053_v5 = vsel %vm775_vm4, %v305_v4, 0  ;;  %1608 = vmatprep.mubr.msk.bf16.mxu0 %vm1823_vm0, %v1822_v0 }
 0x3ff   :  { %1601 = vmatpush3.bf16.msra.mxu1 %v1053_v5  ;;  %v770_v8 = vpack.c.bf16 %v762_v2, %v762_v2  ;;  %1620 = vmatprep.subr.bf16.mxu0 %v1822_v0 }
 0x400   :  { %1612 = vmatprep.subr.bf16.mxu1 %v1822_v0 }
 0x402   :  { %1603 = vmatmul.mubr.msk.bf16.vlgmr.msra.gmra.mrb[28].mxu1 %vm307_vm3, %v770_v8 }
 0x403   :  { %1616 = vmatprep.mubr.msk.bf16.mxu1 %vm1823_vm0, %v1822_v0 }
 0x405   :  { %1609 = vmatmul.mubr.msk.bf16.vlgmr.msra.gmra.mrb[32].mxu0 %vm307_vm3, %v771_v9 }
 0x406   :  { %1624 = vmatprep.mubr.msk.bf16.mxu0 %vm1823_vm0, %v1822_v0 }
 0x48f   :  { %v813_v10 = vpop.f32.mrb[16].mxu1 }
 0x490   :  { %1141 = vst.msk [vmem:[#allocation5] sm:$0xff] %vm307_vm3, %v813_v10  ;;  %v1568_v13 = vpop.f32.mrb[17].mxu1 }
 0x491   :  { %v816_v14 = vpop.f32.mrb[18].mxu1  ;;  %v1454_v13 = vld [vmem:[%s2230_s3] ss:$0 sm:$0xff] }
 0x492   :  { %v1569_v16 = vpop.f32.mrb[19].mxu1 }
 0x493   :  { %v859_v17 = vpop.f32.mrb[20].mxu0 }
 0x494   :  { %1143 = vrot.lane.b32.xlu0 %v859_v17, %s1819_s18  ;;  %v1574_v19 = vpop.f32.mrb[21].mxu0 }
 0x495   :  { %v862_v20 = vpop.f32.mrb[22].mxu0  ;;  %v1455_v19 = vld [vmem:[#allocation11] ss:$0 sm:$0xff] }
 0x496   :  { %v1575_v21 = vpop.f32.mrb[23].mxu0 }
 0x497   :  { %v905_v22 = vpop.f32.mrb[20].mxu1 }
 0x498   :  { %v1580_v23 = vpop.f32.mrb[21].mxu1  ;;  %1149 = vrot.lane.b32.xlu0 %v905_v22, %s1834_s27 }
 0x499   :  { %v908_v24 = vpop.f32.mrb[22].mxu1 }
 0x49a   :  { %v1581_v15 = vpop.f32.mrb[23].mxu1  ;;  %v1654_v24 = vld [vmem:[#allocation12] sm:$0xff]  }
 0x49b   :  { %1621 = vmatpush3.bf16.msra.mxu0 %v1654_v24  ;;  %v1655_v15 = vld [vmem:[#allocation12 + $0x8] sm:$0xff]  }
 0x49c   :  { %1622 = vmatprep.subr.bf16.mxu0 %v1822_v0 }
 0x49f   :  { %v997_v25 = vpop.f32.mrb[24].mxu1  ;;  %1623 = vmatpush3.bf16.msra.mxu0 %v1655_v15 }
 0x4a0   :  { %1160 = vst.msk [vmem:[#allocation5 + $0x8] sm:$0xff] %vm307_vm3, %v997_v25  ;;  %v1592_v26 = vpop.f32.mrb[25].mxu1  ;;  %v1456_v25 = vld [vmem:[%s2233_s6] ss:$0 sm:$0xff] }
 0x4a1   :  { %v1000_v27 = vpop.f32.mrb[26].mxu1 }
 0x4a2   :  { %v1593_v28 = vpop.f32.mrb[27].mxu1 }
 0x4c8   :  { %v951_v29 = vpop.f32.mrb[24].mxu0 }
 0x4c9   :  { %1155 = vrot.lane.b32.xlu0 %v951_v29, %s1835_s24  ;;  %v1586_v30 = vpop.f32.mrb[25].mxu0 }
 0x4ca   :  { %v954_v31 = vpop.f32.mrb[26].mxu0 }
 0x4cb   :  { %v1587_v32 = vpop.f32.mrb[27].mxu0 }
 0x4d0   :  { %v1043_v33 = vpop.f32.mrb[28].mxu0 }
 0x4d1   :  { %1162 = vrot.lane.b32.xlu1 %v1043_v33, %s1819_s18  ;;  %v1598_v34 = vpop.f32.mrb[29].mxu0 }
 0x4d2   :  { %v1046_v35 = vpop.f32.mrb[30].mxu0 }
 0x4d3   :  { %v1599_v36 = vpop.f32.mrb[31].mxu0 }
 0x4d5   :  { %v1089_v18 = vpop.f32.mrb[28].mxu1 }
 0x4d6   :  { %v1604_v37 = vpop.f32.mrb[29].mxu1  ;;  %1167 = vrot.lane.b32.xlu1 %v1089_v18, %s1834_s27 }
 0x4d7   :  { %v1092_v38 = vpop.f32.mrb[30].mxu1 }
 0x4d8   :  { %v1605_v39 = vpop.f32.mrb[31].mxu1  ;;  %v1135_v40 = vpop.f32.mrb[32].mxu0 }
 0x4d9   :  { %v1610_v41 = vpop.f32.mrb[33].mxu0 }
 0x4da   :  { %1172 = vrot.lane.b32.xlu1 %v1135_v40, %s1835_s24  ;;  %v1138_v42 = vpop.f32.mrb[34].mxu0 }
 0x4db   :  { %v1611_v43 = vpop.f32.mrb[35].mxu0 }
 0x506   :  { %v1144_v44 = vpop.permute.xlu0 %1143 }
 0x507   :  { %1147 = vst.msk [vmem:[#allocation5] sm:$0xff] %vm1146_vm5, %v1144_v44 }
 0x50a   :  { %v1150_v45 = vpop.permute.xlu0 %1149 }
 0x50b   :  { %1153 = vst.msk [vmem:[#allocation5] sm:$0xff] %vm1152_vm6, %v1150_v45 }
 0x53b   :  { %v1156_v46 = vpop.permute.xlu0 %1155 }
 0x53c   :  { %1159 = vst.msk [vmem:[#allocation5] sm:$0xff] %vm1158_vm7, %v1156_v46 }
 0x543   :  { %v1163_v47 = vpop.permute.xlu1 %1162  ;;  %v1176_v48 = vld [vmem:[#allocation5] sm:$0xff] }
 0x544   :  { %1165 = vst.msk [vmem:[#allocation5 + $0x8] sm:$0xff] %vm1146_vm5, %v1163_v47  ;;  %v1178_v49 = vadd.f32 %v1176_v48, %v1973_v7 }
 0x546   :  { %v1183_v50 = vsel %vm1182_vm8, %v1178_v49, 0.0 }
 0x547   :  { %1184 = vadd.xlane.f32.xlu0 %v1183_v50 }
 0x548   :  { %v1168_v51 = vpop.permute.xlu1 %1167 }
 0x549   :  { %1170 = vst.msk [vmem:[#allocation5 + $0x8] sm:$0xff] %vm1152_vm6, %v1168_v51 }
 0x54c   :  { %v1173_v52 = vpop.permute.xlu1 %1172 }
 0x54d   :  { %1175 = vst.msk [vmem:[#allocation5 + $0x8] sm:$0xff] %vm1158_vm7, %v1173_v52 }
 0x554   :  { %v1177_v11 = vld [vmem:[#allocation5 + $0x8] sm:$0xff] }
 0x555   :  { %v1179_v53 = vadd.f32 %v1177_v11, %v1980_v12  ;;  %v1652_v12 = vld [vmem:[%s2232_s5] sm:$0xff]  }
 0x556   :  { %1613 = vmatpush3.bf16.msra.mxu1 %v1652_v12 }
 0x557   :  { %v1186_v54 = vsel %vm1182_vm8, %v1179_v53, 0.0  ;;  %1614 = vmatprep.subr.bf16.mxu1 %v1822_v0  ;;  %v1460_v0 = vld [vmem:[%s2235_s8] ss:$0 sm:$0xff] }
 0x558   :  { %1187 = vadd.xlane.f32.xlu1 %v1186_v54 }
 0x55a   :  { %1615 = vmatpush3.bf16.msra.mxu1 %v1653_v1 }
 0x5d4   :  { %v1185_v55 = vpop.xlane.xlu0 %1184 }
 0x5d5   :  { %v1190_v56 = vmul.f32 0.03125, %v1185_v55 }
 0x5d7   :  { %v1192_v57 = vsub.f32 %v1178_v49, %v1190_v56 }
 0x5d9   :  { %v1194_v58 = vmul.f32 %v1192_v57, %v1192_v57 }
 0x5db   :  { %v1196_v59 = vsel %vm1182_vm8, %v1194_v58, 0.0 }
 0x5dc   :  { %1197 = vadd.xlane.f32.xlu0 %v1196_v59 }
 0x5e5   :  { %v1188_v7 = vpop.xlane.xlu1 %1187 }
 0x5e6   :  { %v1191_v60 = vmul.f32 0.03125, %v1188_v7  ;;  %v1464_v7 = vld [vmem:[%s2236_s9] ss:$0 sm:$0xff] }
 0x5e8   :  { %v1193_v61 = vsub.f32 %v1179_v53, %v1191_v60 }
 0x5ea   :  { %v1195_v62 = vmul.f32 %v1193_v61, %v1193_v61 }
 0x5ec   :  { %v1199_v63 = vsel %vm1182_vm8, %v1195_v62, 0.0  ;;  %v1465_v62 = vld [vmem:[%s2237_s10] ss:$0 sm:$0xff] }
 0x5ed   :  { %1200 = vadd.xlane.f32.xlu0 %v1199_v63 }
 0x669   :  { %v1198_v2 = vpop.xlane.xlu0 %1197 }
 0x66a   :  { %v1202_v3 = vmul.f32 0.03125, %v1198_v2 }
 0x66c   :  { %v1204_v4 = vadd.f32 1e-05, %v1202_v3 }
 0x66e   :  { %1688 = vrsqrt.f32 %v1204_v4 }
 0x678   :  { %v1689_v9 = vpop.eup %1688 }
 0x679   :  { %v1208_v10 = vmul.f32 %v1689_v9, %v1192_v57 }
 0x67a   :  { %v1201_v5 = vpop.xlane.xlu0 %1200 }
 0x67b   :  { %v1203_v6 = vmul.f32 0.03125, %v1201_v5  ;;  %v1216_v16 = vmul.f32 %v1454_v13, %v1208_v10 }
 0x67d   :  { %v1205_v8 = vadd.f32 1e-05, %v1203_v6  ;;  %v1224_v21 = vadd.f32 %v1455_v19, %v1216_v16 }
 0x67f   :  { %1690 = vrsqrt.f32 %v1205_v8 }
 0x689   :  { %v1691_v14 = vpop.eup %1690 }
 0x68a   :  { %v1209_v17 = vmul.f32 %v1691_v14, %v1193_v61 }
 0x68c   :  { %v1217_v20 = vmul.f32 %v1454_v13, %v1209_v17 }
 0x68e   :  { %v1225_v22 = vadd.f32 %v1455_v19, %v1217_v20 }
 0x690   :  { %v1226_v23 = vpack.c.bf16 %v1225_v22, %v1224_v21 }
 0x692   :  { %1617 = vmatmul.mubr.msk.bf16.vlgmr.msra.gmra.mrb[32].mxu1 %vm1182_vm8, %v1226_v23 }
 0x765   :  { %v1287_v26 = vpop.f32.mrb[32].mxu1 }
 0x766   :  { %v1288_v27 = vadd.f32 %v1456_v25, %v1287_v26  ;;  %v1618_v28 = vpop.f32.mrb[33].mxu1 }
 0x767   :  { %v1290_v29 = vpop.f32.mrb[34].mxu1 }
 0x768   :  { %v1291_v30 = vadd.f32 %v1456_v25, %v1290_v29  ;;  %v1619_v31 = vpop.f32.mrb[35].mxu1  ;;  %v1294_v32 = vmax.f32 %v1288_v27, 0.0 }
 0x76a   :  { %v1295_v33 = vmax.f32 %v1291_v30, 0.0 }
 0x76c   :  { %v1296_v34 = vpack.c.bf16 %v1295_v33, %v1294_v32 }
 0x76e   :  { %1625 = vmatmul.mubr.msk.bf16.vlgmr.msra.gmra.mrb[36].mxu0 %vm1182_vm8, %v1296_v34 }
 0x841   :  { %v1357_v35 = vpop.f32.mrb[36].mxu0 }
 0x842   :  { %v1358_v36 = vadd.f32 %v1460_v0, %v1357_v35  ;;  %v1626_v18 = vpop.f32.mrb[37].mxu0 }
 0x843   :  { %v1360_v37 = vpop.f32.mrb[38].mxu0 }
 0x844   :  { %v1361_v38 = vadd.f32 %v1460_v0, %v1360_v37  ;;  %v1627_v39 = vpop.f32.mrb[39].mxu0  ;;  %v1364_v40 = vadd.f32 %v1358_v36, %v1224_v21 }
 0x846   :  { %v1368_v41 = vsel %vm1182_vm8, %v1364_v40, 0.0  ;;  %v1365_v42 = vadd.f32 %v1361_v38, %v1225_v22 }
 0x847   :  { %1369 = vadd.xlane.f32.xlu1 %v1368_v41 }
 0x848   :  { %v1371_v43 = vsel %vm1182_vm8, %v1365_v42, 0.0 }
 0x849   :  { %1372 = vadd.xlane.f32.xlu0 %v1371_v43 }
 0x8d4   :  { %v1370_v44 = vpop.xlane.xlu1 %1369 }
 0x8d5   :  { %v1374_v45 = vmul.f32 0.03125, %v1370_v44 }
 0x8d6   :  { %v1373_v46 = vpop.xlane.xlu0 %1372 }
 0x8d7   :  { %v1376_v47 = vsub.f32 %v1364_v40, %v1374_v45  ;;  %v1375_v48 = vmul.f32 0.03125, %v1373_v46 }
 0x8d9   :  { %v1377_v49 = vsub.f32 %v1365_v42, %v1375_v48  ;;  %v1378_v50 = vmul.f32 %v1376_v47, %v1376_v47 }
 0x8db   :  { %v1380_v51 = vsel %vm1182_vm8, %v1378_v50, 0.0  ;;  %v1379_v52 = vmul.f32 %v1377_v49, %v1377_v49 }
 0x8dc   :  { %1381 = vadd.xlane.f32.xlu1 %v1380_v51 }
 0x8dd   :  { %v1383_v11 = vsel %vm1182_vm8, %v1379_v52, 0.0 }
 0x8de   :  { %1384 = vadd.xlane.f32.xlu0 %v1383_v11 }
 0x969   :  { %v1382_v53 = vpop.xlane.xlu1 %1381 }
 0x96a   :  { %v1386_v54 = vmul.f32 0.03125, %v1382_v53 }
 0x96b   :  { %v1385_v55 = vpop.xlane.xlu0 %1384 }
 0x96c   :  { %v1388_v56 = vadd.f32 1e-05, %v1386_v54  ;;  %v1387_v57 = vmul.f32 0.03125, %v1385_v55 }
 0x96e   :  { %1692 = vrsqrt.f32 %v1388_v56  ;;  %v1389_v58 = vadd.f32 1e-05, %v1387_v57 }
 0x970   :  { %1694 = vrsqrt.f32 %v1389_v58 }
 0x978   :  { %v1693_v59 = vpop.eup %1692 }
 0x979   :  { %v1392_v60 = vmul.f32 %v1693_v59, %v1376_v47 }
 0x97a   :  { %v1695_v61 = vpop.eup %1694 }
 0x97b   :  { %v1393_v63 = vmul.f32 %v1695_v61, %v1377_v49  ;;  %v1400_v12 = vmul.f32 %v1464_v7, %v1392_v60 }
 0x97d   :  { %v1401_v1 = vmul.f32 %v1464_v7, %v1393_v63  ;;  %v1408_v2 = vadd.f32 %v1465_v62, %v1400_v12 }
 0x97f   :  { %v1409_v3 = vadd.f32 %v1465_v62, %v1401_v1  ;;  %1410 = vst.msk [vmem:[#allocation14] sm:$0xff] %vm1182_vm8, %v1408_v2 }
 0x981   :  { %1411 = vst.msk [vmem:[#allocation14 + $0x8] sm:$0xff] %vm1182_vm8, %v1409_v3 }
 0x982   :  { %1795 = shalt.err (!%p1792_p8)
}
 0x983   :  { %s1796_s19 = scalar_lea.hbm %s2238_s11, 256 }
 0x984   :  { %p1797_p9 = scmp.ne.s32.totalorder %s2238_s11, %s1796_s19  ;;  %p1800_p10 = scmp.lt.u32.totalorder %s1796_s19, %s2238_s11 }
 0x986   :  { %p1802_p11 = pnand %p1800_p10, %p1797_p9 }
 0x988   :  { %1805 = shalt.err (!%p1802_p11)
}
 0x989   :  { %1423 = dma.vmem_to_hbm [thread:$0]  %s1418_s2, 256, %s2238_s11, [#allocation8], %s1818_s1, %s1818_s1, %s1819_s18  }
 0x98a   :  { %1812 = dma.done.wait [#allocation8], 256  }
 0x98b   :  { %1813 = vsyncadd [#allocation8], 4294967040 }
 0x98c   :  { %1427 = vsyncpa [#allocation7], 1 }
 0x98d   :  { %1428 = vsyncpa [#allocation10], 1 }
 0x98e   :  { %1429 = vsyncpa [#allocation13], 1 }
 0x98f   :  { %1430 = vsyncpa [#allocation8], 1 }

</bundles_post_ra>
